<compile_context>
chip_gen: v7x
topology: tpu7x:2x2x1
jax: 0.10.0
libtpu: 0.0.40
codegen_flags: <defaults>
</compile_context>

<pallas_src>
import functools

import numpy as np
import jax
import jax.numpy as jnp
from jax import lax
from jax.experimental import pallas as pl
from jax.experimental.pallas import tpu as pltpu


_INV_SQRT2 = 0.7071067811865476
_SQRT_2_OVER_PI = 0.7978845608028654


def _erf_f32(z):
    """erf via Abramowitz & Stegun 7.1.26 (|err| < 1.5e-7).

    Built only from exp / mul / add / div / select so the kernel does not
    depend on an erf primitive lowering inside Mosaic.
    """
    az = jnp.abs(z)
    t = 1.0 / (1.0 + 0.3275911 * az)
    poly = t * (0.254829592
           + t * (-0.284496736
           + t * (1.421413741
           + t * (-1.453152027
           + t * 1.061405429))))
    erf_abs = 1.0 - poly * jnp.exp(-az * az)
    return jnp.where(z < 0.0, -erf_abs, erf_abs)


def _gelu_exact(x):
    # torch.nn.GELU() default (erf form).
    return 0.5 * x * (1.0 + _erf_f32(x * _INV_SQRT2))


def _gelu_tanh(x):
    # torch.nn.GELU(approximate="tanh"); tanh runs on the EUP slot.
    return 0.5 * x * (1.0 + jnp.tanh(_SQRT_2_OVER_PI * (x + 0.044715 * x * x * x)))


def _residual_stack_kernel(mask_ref, x_ref, w1_ref, w2_ref, o_ref, *,
                           n_layers, tap_offsets, approximate_gelu):
    """One batch plane per grid step.

    mask_ref: (9, HWp)      f32 {0,1} boundary masks (resident, constant map)
    x_ref   : (1, Cp, HWp)  activation plane, lane dim = padded H*W
    w1_ref  : (9, Crp, Cp)  3x3 conv weights, tap-major, in the MXU dtype
    w2_ref  : (Cp, Crp)     1x1 conv weights, in the MXU dtype
    o_ref   : (1, Cp, HWp)  output plane
    """
    gelu = _gelu_tanh if approximate_gelu else _gelu_exact

    # Loop-invariant operands, loaded / sliced ONCE (weights stay in their
    # possibly-bf16 MXU dtype; only accumulators and the carry are f32).
    w1 = w1_ref[...]
    w2 = w2_ref[...]
    mxu_dtype = w1.dtype
    w1_taps = tuple(w1[t] for t in range(9))               # (Crp, Cp) each
    masks = mask_ref[...]
    mask_rows = tuple(masks[t:t + 1] for t in range(9))    # (1, HWp) each

    x0 = x_ref[0].astype(jnp.float32)                      # residual carry: f32

    def layer(_, x):
        xc = x.astype(mxu_dtype)          # no-op when the input dtype is f32
        # 3x3 SAME conv: 9 shifted taps -> 9 small MXU matmuls, f32 accumulate.
        # Zero padding at the image boundary == lane mask on the tap output.
        acc = jnp.dot(w1_taps[4], xc, preferred_element_type=jnp.float32)
        for t, off in enumerate(tap_offsets):
            if t == 4:
                continue                   # center tap above, always in-bounds
            shifted = xc if off == 0 else jnp.roll(xc, -off, axis=1)
            y = jnp.dot(w1_taps[t], shifted, preferred_element_type=jnp.float32)
            acc = acc + y * mask_rows[t]
        h = gelu(acc)                                             # (Crp, HWp) f32
        r = gelu(jnp.dot(w2, h.astype(mxu_dtype),
                         preferred_element_type=jnp.float32))     # (Cp, HWp) f32
        return x + r

    # Unroll small depths so cross-layer GELU (VALU/EUP) overlaps the next
    # layer's shifts and MXU pushes; keep a rolled loop for large depths.
    x_out = lax.fori_loop(0, n_layers, layer, x0, unroll=(n_layers <= 4))
    o_ref[0] = x_out.astype(o_ref.dtype)


def _round_up(x, m):
    return (x + m - 1) // m * m


def residual_stack_pallas(x_nchw, w1_oihw, w2_oihw, n_res_layers, *,
                          mxu_dtype=None, approximate_gelu=False):
    """x: (N, C, H, W); w1: (res_h_dim, C, 3, 3); w2: (C, res_h_dim, 1, 1)."""
    N, C, H, W = x_nchw.shape
    Cres = w1_oihw.shape[0]
    assert w1_oihw.shape == (Cres, C, 3, 3)
    assert w2_oihw.shape == (C, Cres, 1, 1), "residual add requires h_dim == in_dim"

    in_dtype = x_nchw.dtype
    mxu_dtype = jnp.dtype(in_dtype if mxu_dtype is None else mxu_dtype)

    # Alignment: lane dim (H*W) -> multiple of 128, channel dims -> sublane pack.
    sub = {4: 8, 2: 16, 1: 32}.get(mxu_dtype.itemsize, 8)
    HW = H * W
    HWp = _round_up(HW, 128)
    Cp = _round_up(C, sub)
    Crp = _round_up(Cres, sub)

    # (N, C, H, W) -> (N, C, H*W): free reshape, no transposes / HBM round trips.
    x_flat = jnp.pad(x_nchw.reshape(N, C, HW),
                     ((0, 0), (0, Cp - C), (0, HWp - HW)))

    # Tap-major 3x3 weights (9, Cres, C) and 1x1 weights (C, Cres), zero-padded
    # and cast ONCE to the MXU operand dtype (no in-kernel f32 upcast).
    w1_taps = jnp.transpose(w1_oihw, (2, 3, 0, 1)).reshape(9, Cres, C)
    w1_taps = jnp.pad(w1_taps, ((0, 0), (0, Crp - Cres), (0, Cp - C))).astype(mxu_dtype)
    w2_mat = jnp.pad(w2_oihw[:, :, 0, 0], ((0, Cp - C), (0, Crp - Cres))).astype(mxu_dtype)

    # Flat tap offsets and precomputed "SAME" boundary masks — host constants,
    # so there is no iota / div / mod prologue per grid step inside the kernel.
    offsets = tuple(dy * W + dx for dy in (-1, 0, 1) for dx in (-1, 0, 1))
    p = np.arange(HWp)
    hh, ww = p // W, p % W
    mask_np = np.stack([
        (p < HW) & (hh + dy >= 0) & (hh + dy < H) & (ww + dx >= 0) & (ww + dx < W)
        for dy in (-1, 0, 1) for dx in (-1, 0, 1)
    ]).astype(np.float32)
    mask_arr = jnp.asarray(mask_np)                         # (9, HWp)

    kernel = functools.partial(
        _residual_stack_kernel, n_layers=n_res_layers,
        tap_offsets=offsets, approximate_gelu=approximate_gelu)

    # TODO(synk): for v7x small-batch inference, add a second "parallel" grid
    # axis over row strips (n_layers-row recomputed halo) so both TensorCores
    # get work and the per-block footprint shrinks under the 64 MiB VMEM.
    out_flat = pl.pallas_call(
        kernel,
        out_shape=jax.ShapeDtypeStruct((N, Cp, HWp), in_dtype),
        grid=(N,),
        in_specs=[
            pl.BlockSpec((9, HWp), lambda n: (0, 0)),          # boundary masks
            pl.BlockSpec((1, Cp, HWp), lambda n: (n, 0, 0)),   # activation plane
            pl.BlockSpec((9, Crp, Cp), lambda n: (0, 0, 0)),   # conv3x3 taps
            pl.BlockSpec((Cp, Crp), lambda n: (0, 0)),         # conv1x1
        ],
        out_specs=pl.BlockSpec((1, Cp, HWp), lambda n: (n, 0, 0)),
        compiler_params=pltpu.CompilerParams(
            dimension_semantics=("parallel",),
            vmem_limit_bytes=64 * 1024 * 1024),
    )(mask_arr, x_flat, w1_taps, w2_mat)

    return out_flat[:, :C, :HW].reshape(N, C, H, W)


def residual_stack_ref(x_nchw, w1_oihw, w2_oihw, n_res_layers):
    """Pure-JAX NCHW reference mirroring the PyTorch forward (exact GELU)."""
    dn = ("NCHW", "OIHW", "NCHW")
    x = x_nchw
    for _ in range(n_res_layers):
        h = lax.conv_general_dilated(x, w1_oihw, (1, 1), "SAME",
                                     dimension_numbers=dn)
        h = jax.nn.gelu(h, approximate=False)
        h = lax.conv_general_dilated(h, w2_oihw, (1, 1), "VALID",
                                     dimension_numbers=dn)
        h = jax.nn.gelu(h, approximate=False)
        x = x + h
    return x


if __name__ == "__main__":
    # Small shapes consistent with the module (residual add needs in_dim == h_dim).
    N, C, H, W = 2, 8, 16, 16      # batch, in_dim == h_dim, spatial
    Cres = 8                       # res_h_dim
    n_res_layers = 3

    key = jax.random.PRNGKey(0)
    kx, k1, k2 = jax.random.split(key, 3)
    x = jax.random.normal(kx, (N, C, H, W), jnp.float32)
    w1 = jax.random.normal(k1, (Cres, C, 3, 3), jnp.float32) * 0.1   # Conv2d OIHW
    w2 = jax.random.normal(k2, (C, Cres, 1, 1), jnp.float32) * 0.1

    out = jax.block_until_ready(residual_stack_pallas(x, w1, w2, n_res_layers))

    ref = residual_stack_ref(x, w1, w2, n_res_layers)
    assert out.shape == ref.shape == (N, C, H, W)
    err = float(jnp.max(jnp.abs(out - ref)))
    assert jnp.allclose(out, ref, rtol=2e-4, atol=2e-4), f"max abs err = {err}"
    print("KERNEL_OK")
</pallas_src>

<mosaic_0001>
module attributes {stable_mosaic.version = 11 : i64} {
  func.func @_residual_stack_kernel(%arg0: i32, %arg1: memref<9x256xf32, #tpu.memory_space<vmem>>, %arg2: memref<1x8x256xf32, #tpu.memory_space<vmem>>, %arg3: memref<9x8x8xf32, #tpu.memory_space<vmem>>, %arg4: memref<8x8xf32, #tpu.memory_space<vmem>>, %arg5: memref<1x8x256xf32, #tpu.memory_space<vmem>>) attributes {dimension_semantics = [#tpu.dimension_semantics<parallel>], iteration_bounds = array<i64: 2>, scalar_prefetch = 0 : i64, scratch_operands = 0 : i64, tpu.core_type = #tpu.core_type<tc>, window_params = [{pipeline_mode = #tpu.pipeline_mode<synchronous>, transform_indices = @transform_0, window_bounds = array<i64: 9, 256>}, {transform_indices = @transform_1, window_bounds = array<i64: 1, 8, 256>}, {pipeline_mode = #tpu.pipeline_mode<synchronous>, transform_indices = @transform_2, window_bounds = array<i64: 9, 8, 8>}, {pipeline_mode = #tpu.pipeline_mode<synchronous>, transform_indices = @transform_3, window_bounds = array<i64: 8, 8>}, {transform_indices = @transform_4, window_bounds = array<i64: 1, 8, 256>}]} {
    %c0 = arith.constant 0 : index
    %c0_0 = arith.constant 0 : index
    %c0_1 = arith.constant 0 : index
    %0 = vector.load %arg3[%c0, %c0_0, %c0_1] : memref<9x8x8xf32, #tpu.memory_space<vmem>>, vector<9x8x8xf32>
    %c0_2 = arith.constant 0 : index
    %c0_3 = arith.constant 0 : index
    %1 = vector.load %arg4[%c0_2, %c0_3] : memref<8x8xf32, #tpu.memory_space<vmem>>, vector<8x8xf32>
    %2 = vector.extract_strided_slice %0 {offsets = [0, 0, 0], sizes = [1, 8, 8], strides = [1, 1, 1]} : vector<9x8x8xf32> to vector<1x8x8xf32>
    %3 = vector.shape_cast %2 : vector<1x8x8xf32> to vector<8x8xf32>
    %4 = vector.extract_strided_slice %0 {offsets = [1, 0, 0], sizes = [1, 8, 8], strides = [1, 1, 1]} : vector<9x8x8xf32> to vector<1x8x8xf32>
    %5 = vector.shape_cast %4 : vector<1x8x8xf32> to vector<8x8xf32>
    %6 = vector.extract_strided_slice %0 {offsets = [2, 0, 0], sizes = [1, 8, 8], strides = [1, 1, 1]} : vector<9x8x8xf32> to vector<1x8x8xf32>
    %7 = vector.shape_cast %6 : vector<1x8x8xf32> to vector<8x8xf32>
    %8 = vector.extract_strided_slice %0 {offsets = [3, 0, 0], sizes = [1, 8, 8], strides = [1, 1, 1]} : vector<9x8x8xf32> to vector<1x8x8xf32>
    %9 = vector.shape_cast %8 : vector<1x8x8xf32> to vector<8x8xf32>
    %10 = vector.extract_strided_slice %0 {offsets = [4, 0, 0], sizes = [1, 8, 8], strides = [1, 1, 1]} : vector<9x8x8xf32> to vector<1x8x8xf32>
    %11 = vector.shape_cast %10 : vector<1x8x8xf32> to vector<8x8xf32>
    %12 = vector.extract_strided_slice %0 {offsets = [5, 0, 0], sizes = [1, 8, 8], strides = [1, 1, 1]} : vector<9x8x8xf32> to vector<1x8x8xf32>
    %13 = vector.shape_cast %12 : vector<1x8x8xf32> to vector<8x8xf32>
    %14 = vector.extract_strided_slice %0 {offsets = [6, 0, 0], sizes = [1, 8, 8], strides = [1, 1, 1]} : vector<9x8x8xf32> to vector<1x8x8xf32>
    %15 = vector.shape_cast %14 : vector<1x8x8xf32> to vector<8x8xf32>
    %16 = vector.extract_strided_slice %0 {offsets = [7, 0, 0], sizes = [1, 8, 8], strides = [1, 1, 1]} : vector<9x8x8xf32> to vector<1x8x8xf32>
    %17 = vector.shape_cast %16 : vector<1x8x8xf32> to vector<8x8xf32>
    %18 = vector.extract_strided_slice %0 {offsets = [8, 0, 0], sizes = [1, 8, 8], strides = [1, 1, 1]} : vector<9x8x8xf32> to vector<1x8x8xf32>
    %19 = vector.shape_cast %18 : vector<1x8x8xf32> to vector<8x8xf32>
    %c0_4 = arith.constant 0 : index
    %c0_5 = arith.constant 0 : index
    %20 = vector.load %arg1[%c0_4, %c0_5] : memref<9x256xf32, #tpu.memory_space<vmem>>, vector<9x256xf32>
    %21 = vector.extract_strided_slice %20 {offsets = [0, 0], sizes = [1, 256], strides = [1, 1]} : vector<9x256xf32> to vector<1x256xf32>
    %22 = vector.extract_strided_slice %20 {offsets = [1, 0], sizes = [1, 256], strides = [1, 1]} : vector<9x256xf32> to vector<1x256xf32>
    %23 = vector.extract_strided_slice %20 {offsets = [2, 0], sizes = [1, 256], strides = [1, 1]} : vector<9x256xf32> to vector<1x256xf32>
    %24 = vector.extract_strided_slice %20 {offsets = [3, 0], sizes = [1, 256], strides = [1, 1]} : vector<9x256xf32> to vector<1x256xf32>
    %25 = vector.extract_strided_slice %20 {offsets = [5, 0], sizes = [1, 256], strides = [1, 1]} : vector<9x256xf32> to vector<1x256xf32>
    %26 = vector.extract_strided_slice %20 {offsets = [6, 0], sizes = [1, 256], strides = [1, 1]} : vector<9x256xf32> to vector<1x256xf32>
    %27 = vector.extract_strided_slice %20 {offsets = [7, 0], sizes = [1, 256], strides = [1, 1]} : vector<9x256xf32> to vector<1x256xf32>
    %28 = vector.extract_strided_slice %20 {offsets = [8, 0], sizes = [1, 256], strides = [1, 1]} : vector<9x256xf32> to vector<1x256xf32>
    %c0_6 = arith.constant 0 : index
    %c0_7 = arith.constant 0 : index
    %c0_8 = arith.constant 0 : index
    %29 = vector.load %arg2[%c0_6, %c0_7, %c0_8] : memref<1x8x256xf32, #tpu.memory_space<vmem>>, vector<1x8x256xf32>
    %30 = vector.shape_cast %29 : vector<1x8x256xf32> to vector<8x256xf32>
    %c0_i32 = arith.constant 0 : i32
    %cst = arith.constant dense<0.000000e+00> : vector<8x256xf32>
    %31 = tpu.matmul %11, %30, %cst {dimension_numbers = #tpu.dot_dimension_numbers<[1], [0], [0], [1], [0, 0, 1, 1], [], []>} : vector<8x8xf32>, vector<8x256xf32>, vector<8x256xf32> -> vector<8x256xf32>
    %32 = vector.extract_strided_slice %30 {offsets = [0, 239], sizes = [8, 17], strides = [1, 1]} : vector<8x256xf32> to vector<8x17xf32>
    %33 = vector.extract_strided_slice %30 {offsets = [0, 0], sizes = [8, 239], strides = [1, 1]} : vector<8x256xf32> to vector<8x239xf32>
    %34 = tpu.concatenate %32, %33 in 1 : vector<8x17xf32>, vector<8x239xf32> -> vector<8x256xf32>
    %cst_9 = arith.constant dense<0.000000e+00> : vector<8x256xf32>
    %35 = tpu.matmul %3, %34, %cst_9 {dimension_numbers = #tpu.dot_dimension_numbers<[1], [0], [0], [1], [0, 0, 1, 1], [], []>} : vector<8x8xf32>, vector<8x256xf32>, vector<8x256xf32> -> vector<8x256xf32>
    %36 = vector.broadcast %21 : vector<1x256xf32> to vector<8x256xf32>
    %37 = arith.mulf %35, %36 : vector<8x256xf32>
    %38 = arith.addf %31, %37 : vector<8x256xf32>
    %39 = vector.extract_strided_slice %30 {offsets = [0, 240], sizes = [8, 16], strides = [1, 1]} : vector<8x256xf32> to vector<8x16xf32>
    %40 = vector.extract_strided_slice %30 {offsets = [0, 0], sizes = [8, 240], strides = [1, 1]} : vector<8x256xf32> to vector<8x240xf32>
    %41 = tpu.concatenate %39, %40 in 1 : vector<8x16xf32>, vector<8x240xf32> -> vector<8x256xf32>
    %cst_10 = arith.constant dense<0.000000e+00> : vector<8x256xf32>
    %42 = tpu.matmul %5, %41, %cst_10 {dimension_numbers = #tpu.dot_dimension_numbers<[1], [0], [0], [1], [0, 0, 1, 1], [], []>} : vector<8x8xf32>, vector<8x256xf32>, vector<8x256xf32> -> vector<8x256xf32>
    %43 = vector.broadcast %22 : vector<1x256xf32> to vector<8x256xf32>
    %44 = arith.mulf %42, %43 : vector<8x256xf32>
    %45 = arith.addf %38, %44 : vector<8x256xf32>
    %46 = vector.extract_strided_slice %30 {offsets = [0, 241], sizes = [8, 15], strides = [1, 1]} : vector<8x256xf32> to vector<8x15xf32>
    %47 = vector.extract_strided_slice %30 {offsets = [0, 0], sizes = [8, 241], strides = [1, 1]} : vector<8x256xf32> to vector<8x241xf32>
    %48 = tpu.concatenate %46, %47 in 1 : vector<8x15xf32>, vector<8x241xf32> -> vector<8x256xf32>
    %cst_11 = arith.constant dense<0.000000e+00> : vector<8x256xf32>
    %49 = tpu.matmul %7, %48, %cst_11 {dimension_numbers = #tpu.dot_dimension_numbers<[1], [0], [0], [1], [0, 0, 1, 1], [], []>} : vector<8x8xf32>, vector<8x256xf32>, vector<8x256xf32> -> vector<8x256xf32>
    %50 = vector.broadcast %23 : vector<1x256xf32> to vector<8x256xf32>
    %51 = arith.mulf %49, %50 : vector<8x256xf32>
    %52 = arith.addf %45, %51 : vector<8x256xf32>
    %53 = vector.extract_strided_slice %30 {offsets = [0, 255], sizes = [8, 1], strides = [1, 1]} : vector<8x256xf32> to vector<8x1xf32>
    %54 = vector.extract_strided_slice %30 {offsets = [0, 0], sizes = [8, 255], strides = [1, 1]} : vector<8x256xf32> to vector<8x255xf32>
    %55 = tpu.concatenate %53, %54 in 1 : vector<8x1xf32>, vector<8x255xf32> -> vector<8x256xf32>
    %cst_12 = arith.constant dense<0.000000e+00> : vector<8x256xf32>
    %56 = tpu.matmul %9, %55, %cst_12 {dimension_numbers = #tpu.dot_dimension_numbers<[1], [0], [0], [1], [0, 0, 1, 1], [], []>} : vector<8x8xf32>, vector<8x256xf32>, vector<8x256xf32> -> vector<8x256xf32>
    %57 = vector.broadcast %24 : vector<1x256xf32> to vector<8x256xf32>
    %58 = arith.mulf %56, %57 : vector<8x256xf32>
    %59 = arith.addf %52, %58 : vector<8x256xf32>
    %60 = vector.extract_strided_slice %30 {offsets = [0, 1], sizes = [8, 255], strides = [1, 1]} : vector<8x256xf32> to vector<8x255xf32>
    %61 = vector.extract_strided_slice %30 {offsets = [0, 0], sizes = [8, 1], strides = [1, 1]} : vector<8x256xf32> to vector<8x1xf32>
    %62 = tpu.concatenate %60, %61 in 1 : vector<8x255xf32>, vector<8x1xf32> -> vector<8x256xf32>
    %cst_13 = arith.constant dense<0.000000e+00> : vector<8x256xf32>
    %63 = tpu.matmul %13, %62, %cst_13 {dimension_numbers = #tpu.dot_dimension_numbers<[1], [0], [0], [1], [0, 0, 1, 1], [], []>} : vector<8x8xf32>, vector<8x256xf32>, vector<8x256xf32> -> vector<8x256xf32>
    %64 = vector.broadcast %25 : vector<1x256xf32> to vector<8x256xf32>
    %65 = arith.mulf %63, %64 : vector<8x256xf32>
    %66 = arith.addf %59, %65 : vector<8x256xf32>
    %67 = vector.extract_strided_slice %30 {offsets = [0, 15], sizes = [8, 241], strides = [1, 1]} : vector<8x256xf32> to vector<8x241xf32>
    %68 = vector.extract_strided_slice %30 {offsets = [0, 0], sizes = [8, 15], strides = [1, 1]} : vector<8x256xf32> to vector<8x15xf32>
    %69 = tpu.concatenate %67, %68 in 1 : vector<8x241xf32>, vector<8x15xf32> -> vector<8x256xf32>
    %cst_14 = arith.constant dense<0.000000e+00> : vector<8x256xf32>
    %70 = tpu.matmul %15, %69, %cst_14 {dimension_numbers = #tpu.dot_dimension_numbers<[1], [0], [0], [1], [0, 0, 1, 1], [], []>} : vector<8x8xf32>, vector<8x256xf32>, vector<8x256xf32> -> vector<8x256xf32>
    %71 = vector.broadcast %26 : vector<1x256xf32> to vector<8x256xf32>
    %72 = arith.mulf %70, %71 : vector<8x256xf32>
    %73 = arith.addf %66, %72 : vector<8x256xf32>
    %74 = vector.extract_strided_slice %30 {offsets = [0, 16], sizes = [8, 240], strides = [1, 1]} : vector<8x256xf32> to vector<8x240xf32>
    %75 = vector.extract_strided_slice %30 {offsets = [0, 0], sizes = [8, 16], strides = [1, 1]} : vector<8x256xf32> to vector<8x16xf32>
    %76 = tpu.concatenate %74, %75 in 1 : vector<8x240xf32>, vector<8x16xf32> -> vector<8x256xf32>
    %cst_15 = arith.constant dense<0.000000e+00> : vector<8x256xf32>
    %77 = tpu.matmul %17, %76, %cst_15 {dimension_numbers = #tpu.dot_dimension_numbers<[1], [0], [0], [1], [0, 0, 1, 1], [], []>} : vector<8x8xf32>, vector<8x256xf32>, vector<8x256xf32> -> vector<8x256xf32>
    %78 = vector.broadcast %27 : vector<1x256xf32> to vector<8x256xf32>
    %79 = arith.mulf %77, %78 : vector<8x256xf32>
    %80 = arith.addf %73, %79 : vector<8x256xf32>
    %81 = vector.extract_strided_slice %30 {offsets = [0, 17], sizes = [8, 239], strides = [1, 1]} : vector<8x256xf32> to vector<8x239xf32>
    %82 = vector.extract_strided_slice %30 {offsets = [0, 0], sizes = [8, 17], strides = [1, 1]} : vector<8x256xf32> to vector<8x17xf32>
    %83 = tpu.concatenate %81, %82 in 1 : vector<8x239xf32>, vector<8x17xf32> -> vector<8x256xf32>
    %cst_16 = arith.constant dense<0.000000e+00> : vector<8x256xf32>
    %84 = tpu.matmul %19, %83, %cst_16 {dimension_numbers = #tpu.dot_dimension_numbers<[1], [0], [0], [1], [0, 0, 1, 1], [], []>} : vector<8x8xf32>, vector<8x256xf32>, vector<8x256xf32> -> vector<8x256xf32>
    %85 = vector.broadcast %28 : vector<1x256xf32> to vector<8x256xf32>
    %86 = arith.mulf %84, %85 : vector<8x256xf32>
    %87 = arith.addf %80, %86 : vector<8x256xf32>
    %cst_17 = arith.constant 5.000000e-01 : f32
    %88 = vector.broadcast %cst_17 : f32 to vector<8x256xf32>
    %89 = arith.mulf %88, %87 : vector<8x256xf32>
    %cst_18 = arith.constant 0.707106769 : f32
    %90 = vector.broadcast %cst_18 : f32 to vector<8x256xf32>
    %91 = arith.mulf %87, %90 : vector<8x256xf32>
    %92 = math.absf %91 : vector<8x256xf32>
    %cst_19 = arith.constant 0.327591091 : f32
    %93 = vector.broadcast %cst_19 : f32 to vector<8x256xf32>
    %94 = arith.mulf %93, %92 : vector<8x256xf32>
    %cst_20 = arith.constant 1.000000e+00 : f32
    %95 = vector.broadcast %cst_20 : f32 to vector<8x256xf32>
    %96 = arith.addf %95, %94 : vector<8x256xf32>
    %cst_21 = arith.constant 1.000000e+00 : f32
    %97 = vector.broadcast %cst_21 : f32 to vector<8x256xf32>
    %98 = arith.divf %97, %96 : vector<8x256xf32>
    %cst_22 = arith.constant 1.06140542 : f32
    %99 = vector.broadcast %cst_22 : f32 to vector<8x256xf32>
    %100 = arith.mulf %98, %99 : vector<8x256xf32>
    %cst_23 = arith.constant -1.45315206 : f32
    %101 = vector.broadcast %cst_23 : f32 to vector<8x256xf32>
    %102 = arith.addf %101, %100 : vector<8x256xf32>
    %103 = arith.mulf %98, %102 : vector<8x256xf32>
    %cst_24 = arith.constant 1.42141378 : f32
    %104 = vector.broadcast %cst_24 : f32 to vector<8x256xf32>
    %105 = arith.addf %104, %103 : vector<8x256xf32>
    %106 = arith.mulf %98, %105 : vector<8x256xf32>
    %cst_25 = arith.constant -0.284496725 : f32
    %107 = vector.broadcast %cst_25 : f32 to vector<8x256xf32>
    %108 = arith.addf %107, %106 : vector<8x256xf32>
    %109 = arith.mulf %98, %108 : vector<8x256xf32>
    %cst_26 = arith.constant 0.254829586 : f32
    %110 = vector.broadcast %cst_26 : f32 to vector<8x256xf32>
    %111 = arith.addf %110, %109 : vector<8x256xf32>
    %112 = arith.mulf %98, %111 : vector<8x256xf32>
    %cst_27 = arith.constant 0.000000e+00 : f32
    %113 = vector.broadcast %cst_27 : f32 to vector<8x256xf32>
    %114 = arith.subf %113, %92 : vector<8x256xf32>
    %115 = arith.mulf %114, %92 : vector<8x256xf32>
    %116 = math.exp %115 : vector<8x256xf32>
    %117 = arith.mulf %112, %116 : vector<8x256xf32>
    %cst_28 = arith.constant 1.000000e+00 : f32
    %118 = vector.broadcast %cst_28 : f32 to vector<8x256xf32>
    %119 = arith.subf %118, %117 : vector<8x256xf32>
    %cst_29 = arith.constant 0.000000e+00 : f32
    %120 = vector.broadcast %cst_29 : f32 to vector<8x256xf32>
    %121 = arith.cmpf olt, %91, %120 : vector<8x256xf32>
    %cst_30 = arith.constant 0.000000e+00 : f32
    %122 = vector.broadcast %cst_30 : f32 to vector<8x256xf32>
    %123 = arith.subf %122, %119 : vector<8x256xf32>
    %124 = arith.select %121, %123, %119 : vector<8x256xi1>, vector<8x256xf32>
    %cst_31 = arith.constant 1.000000e+00 : f32
    %125 = vector.broadcast %cst_31 : f32 to vector<8x256xf32>
    %126 = arith.addf %125, %124 : vector<8x256xf32>
    %127 = arith.mulf %89, %126 : vector<8x256xf32>
    %cst_32 = arith.constant dense<0.000000e+00> : vector<8x256xf32>
    %128 = tpu.matmul %1, %127, %cst_32 {dimension_numbers = #tpu.dot_dimension_numbers<[1], [0], [0], [1], [0, 0, 1, 1], [], []>} : vector<8x8xf32>, vector<8x256xf32>, vector<8x256xf32> -> vector<8x256xf32>
    %cst_33 = arith.constant 5.000000e-01 : f32
    %129 = vector.broadcast %cst_33 : f32 to vector<8x256xf32>
    %130 = arith.mulf %129, %128 : vector<8x256xf32>
    %cst_34 = arith.constant 0.707106769 : f32
    %131 = vector.broadcast %cst_34 : f32 to vector<8x256xf32>
    %132 = arith.mulf %128, %131 : vector<8x256xf32>
    %133 = math.absf %132 : vector<8x256xf32>
    %cst_35 = arith.constant 0.327591091 : f32
    %134 = vector.broadcast %cst_35 : f32 to vector<8x256xf32>
    %135 = arith.mulf %134, %133 : vector<8x256xf32>
    %cst_36 = arith.constant 1.000000e+00 : f32
    %136 = vector.broadcast %cst_36 : f32 to vector<8x256xf32>
    %137 = arith.addf %136, %135 : vector<8x256xf32>
    %cst_37 = arith.constant 1.000000e+00 : f32
    %138 = vector.broadcast %cst_37 : f32 to vector<8x256xf32>
    %139 = arith.divf %138, %137 : vector<8x256xf32>
    %cst_38 = arith.constant 1.06140542 : f32
    %140 = vector.broadcast %cst_38 : f32 to vector<8x256xf32>
    %141 = arith.mulf %139, %140 : vector<8x256xf32>
    %cst_39 = arith.constant -1.45315206 : f32
    %142 = vector.broadcast %cst_39 : f32 to vector<8x256xf32>
    %143 = arith.addf %142, %141 : vector<8x256xf32>
    %144 = arith.mulf %139, %143 : vector<8x256xf32>
    %cst_40 = arith.constant 1.42141378 : f32
    %145 = vector.broadcast %cst_40 : f32 to vector<8x256xf32>
    %146 = arith.addf %145, %144 : vector<8x256xf32>
    %147 = arith.mulf %139, %146 : vector<8x256xf32>
    %cst_41 = arith.constant -0.284496725 : f32
    %148 = vector.broadcast %cst_41 : f32 to vector<8x256xf32>
    %149 = arith.addf %148, %147 : vector<8x256xf32>
    %150 = arith.mulf %139, %149 : vector<8x256xf32>
    %cst_42 = arith.constant 0.254829586 : f32
    %151 = vector.broadcast %cst_42 : f32 to vector<8x256xf32>
    %152 = arith.addf %151, %150 : vector<8x256xf32>
    %153 = arith.mulf %139, %152 : vector<8x256xf32>
    %cst_43 = arith.constant 0.000000e+00 : f32
    %154 = vector.broadcast %cst_43 : f32 to vector<8x256xf32>
    %155 = arith.subf %154, %133 : vector<8x256xf32>
    %156 = arith.mulf %155, %133 : vector<8x256xf32>
    %157 = math.exp %156 : vector<8x256xf32>
    %158 = arith.mulf %153, %157 : vector<8x256xf32>
    %cst_44 = arith.constant 1.000000e+00 : f32
    %159 = vector.broadcast %cst_44 : f32 to vector<8x256xf32>
    %160 = arith.subf %159, %158 : vector<8x256xf32>
    %cst_45 = arith.constant 0.000000e+00 : f32
    %161 = vector.broadcast %cst_45 : f32 to vector<8x256xf32>
    %162 = arith.cmpf olt, %132, %161 : vector<8x256xf32>
    %cst_46 = arith.constant 0.000000e+00 : f32
    %163 = vector.broadcast %cst_46 : f32 to vector<8x256xf32>
    %164 = arith.subf %163, %160 : vector<8x256xf32>
    %165 = arith.select %162, %164, %160 : vector<8x256xi1>, vector<8x256xf32>
    %cst_47 = arith.constant 1.000000e+00 : f32
    %166 = vector.broadcast %cst_47 : f32 to vector<8x256xf32>
    %167 = arith.addf %166, %165 : vector<8x256xf32>
    %168 = arith.mulf %130, %167 : vector<8x256xf32>
    %169 = arith.addf %30, %168 : vector<8x256xf32>
    %c1_i32 = arith.constant 1 : i32
    %cst_48 = arith.constant dense<0.000000e+00> : vector<8x256xf32>
    %170 = tpu.matmul %11, %169, %cst_48 {dimension_numbers = #tpu.dot_dimension_numbers<[1], [0], [0], [1], [0, 0, 1, 1], [], []>} : vector<8x8xf32>, vector<8x256xf32>, vector<8x256xf32> -> vector<8x256xf32>
    %171 = vector.extract_strided_slice %169 {offsets = [0, 239], sizes = [8, 17], strides = [1, 1]} : vector<8x256xf32> to vector<8x17xf32>
    %172 = vector.extract_strided_slice %169 {offsets = [0, 0], sizes = [8, 239], strides = [1, 1]} : vector<8x256xf32> to vector<8x239xf32>
    %173 = tpu.concatenate %171, %172 in 1 : vector<8x17xf32>, vector<8x239xf32> -> vector<8x256xf32>
    %cst_49 = arith.constant dense<0.000000e+00> : vector<8x256xf32>
    %174 = tpu.matmul %3, %173, %cst_49 {dimension_numbers = #tpu.dot_dimension_numbers<[1], [0], [0], [1], [0, 0, 1, 1], [], []>} : vector<8x8xf32>, vector<8x256xf32>, vector<8x256xf32> -> vector<8x256xf32>
    %175 = vector.broadcast %21 : vector<1x256xf32> to vector<8x256xf32>
    %176 = arith.mulf %174, %175 : vector<8x256xf32>
    %177 = arith.addf %170, %176 : vector<8x256xf32>
    %178 = vector.extract_strided_slice %169 {offsets = [0, 240], sizes = [8, 16], strides = [1, 1]} : vector<8x256xf32> to vector<8x16xf32>
    %179 = vector.extract_strided_slice %169 {offsets = [0, 0], sizes = [8, 240], strides = [1, 1]} : vector<8x256xf32> to vector<8x240xf32>
    %180 = tpu.concatenate %178, %179 in 1 : vector<8x16xf32>, vector<8x240xf32> -> vector<8x256xf32>
    %cst_50 = arith.constant dense<0.000000e+00> : vector<8x256xf32>
    %181 = tpu.matmul %5, %180, %cst_50 {dimension_numbers = #tpu.dot_dimension_numbers<[1], [0], [0], [1], [0, 0, 1, 1], [], []>} : vector<8x8xf32>, vector<8x256xf32>, vector<8x256xf32> -> vector<8x256xf32>
    %182 = vector.broadcast %22 : vector<1x256xf32> to vector<8x256xf32>
    %183 = arith.mulf %181, %182 : vector<8x256xf32>
    %184 = arith.addf %177, %183 : vector<8x256xf32>
    %185 = vector.extract_strided_slice %169 {offsets = [0, 241], sizes = [8, 15], strides = [1, 1]} : vector<8x256xf32> to vector<8x15xf32>
    %186 = vector.extract_strided_slice %169 {offsets = [0, 0], sizes = [8, 241], strides = [1, 1]} : vector<8x256xf32> to vector<8x241xf32>
    %187 = tpu.concatenate %185, %186 in 1 : vector<8x15xf32>, vector<8x241xf32> -> vector<8x256xf32>
    %cst_51 = arith.constant dense<0.000000e+00> : vector<8x256xf32>
    %188 = tpu.matmul %7, %187, %cst_51 {dimension_numbers = #tpu.dot_dimension_numbers<[1], [0], [0], [1], [0, 0, 1, 1], [], []>} : vector<8x8xf32>, vector<8x256xf32>, vector<8x256xf32> -> vector<8x256xf32>
    %189 = vector.broadcast %23 : vector<1x256xf32> to vector<8x256xf32>
    %190 = arith.mulf %188, %189 : vector<8x256xf32>
    %191 = arith.addf %184, %190 : vector<8x256xf32>
    %192 = vector.extract_strided_slice %169 {offsets = [0, 255], sizes = [8, 1], strides = [1, 1]} : vector<8x256xf32> to vector<8x1xf32>
    %193 = vector.extract_strided_slice %169 {offsets = [0, 0], sizes = [8, 255], strides = [1, 1]} : vector<8x256xf32> to vector<8x255xf32>
    %194 = tpu.concatenate %192, %193 in 1 : vector<8x1xf32>, vector<8x255xf32> -> vector<8x256xf32>
    %cst_52 = arith.constant dense<0.000000e+00> : vector<8x256xf32>
    %195 = tpu.matmul %9, %194, %cst_52 {dimension_numbers = #tpu.dot_dimension_numbers<[1], [0], [0], [1], [0, 0, 1, 1], [], []>} : vector<8x8xf32>, vector<8x256xf32>, vector<8x256xf32> -> vector<8x256xf32>
    %196 = vector.broadcast %24 : vector<1x256xf32> to vector<8x256xf32>
    %197 = arith.mulf %195, %196 : vector<8x256xf32>
    %198 = arith.addf %191, %197 : vector<8x256xf32>
    %199 = vector.extract_strided_slice %169 {offsets = [0, 1], sizes = [8, 255], strides = [1, 1]} : vector<8x256xf32> to vector<8x255xf32>
    %200 = vector.extract_strided_slice %169 {offsets = [0, 0], sizes = [8, 1], strides = [1, 1]} : vector<8x256xf32> to vector<8x1xf32>
    %201 = tpu.concatenate %199, %200 in 1 : vector<8x255xf32>, vector<8x1xf32> -> vector<8x256xf32>
    %cst_53 = arith.constant dense<0.000000e+00> : vector<8x256xf32>
    %202 = tpu.matmul %13, %201, %cst_53 {dimension_numbers = #tpu.dot_dimension_numbers<[1], [0], [0], [1], [0, 0, 1, 1], [], []>} : vector<8x8xf32>, vector<8x256xf32>, vector<8x256xf32> -> vector<8x256xf32>
    %203 = vector.broadcast %25 : vector<1x256xf32> to vector<8x256xf32>
    %204 = arith.mulf %202, %203 : vector<8x256xf32>
    %205 = arith.addf %198, %204 : vector<8x256xf32>
    %206 = vector.extract_strided_slice %169 {offsets = [0, 15], sizes = [8, 241], strides = [1, 1]} : vector<8x256xf32> to vector<8x241xf32>
    %207 = vector.extract_strided_slice %169 {offsets = [0, 0], sizes = [8, 15], strides = [1, 1]} : vector<8x256xf32> to vector<8x15xf32>
    %208 = tpu.concatenate %206, %207 in 1 : vector<8x241xf32>, vector<8x15xf32> -> vector<8x256xf32>
    %cst_54 = arith.constant dense<0.000000e+00> : vector<8x256xf32>
    %209 = tpu.matmul %15, %208, %cst_54 {dimension_numbers = #tpu.dot_dimension_numbers<[1], [0], [0], [1], [0, 0, 1, 1], [], []>} : vector<8x8xf32>, vector<8x256xf32>, vector<8x256xf32> -> vector<8x256xf32>
    %210 = vector.broadcast %26 : vector<1x256xf32> to vector<8x256xf32>
    %211 = arith.mulf %209, %210 : vector<8x256xf32>
    %212 = arith.addf %205, %211 : vector<8x256xf32>
    %213 = vector.extract_strided_slice %169 {offsets = [0, 16], sizes = [8, 240], strides = [1, 1]} : vector<8x256xf32> to vector<8x240xf32>
    %214 = vector.extract_strided_slice %169 {offsets = [0, 0], sizes = [8, 16], strides = [1, 1]} : vector<8x256xf32> to vector<8x16xf32>
    %215 = tpu.concatenate %213, %214 in 1 : vector<8x240xf32>, vector<8x16xf32> -> vector<8x256xf32>
    %cst_55 = arith.constant dense<0.000000e+00> : vector<8x256xf32>
    %216 = tpu.matmul %17, %215, %cst_55 {dimension_numbers = #tpu.dot_dimension_numbers<[1], [0], [0], [1], [0, 0, 1, 1], [], []>} : vector<8x8xf32>, vector<8x256xf32>, vector<8x256xf32> -> vector<8x256xf32>
    %217 = vector.broadcast %27 : vector<1x256xf32> to vector<8x256xf32>
    %218 = arith.mulf %216, %217 : vector<8x256xf32>
    %219 = arith.addf %212, %218 : vector<8x256xf32>
    %220 = vector.extract_strided_slice %169 {offsets = [0, 17], sizes = [8, 239], strides = [1, 1]} : vector<8x256xf32> to vector<8x239xf32>
    %221 = vector.extract_strided_slice %169 {offsets = [0, 0], sizes = [8, 17], strides = [1, 1]} : vector<8x256xf32> to vector<8x17xf32>
    %222 = tpu.concatenate %220, %221 in 1 : vector<8x239xf32>, vector<8x17xf32> -> vector<8x256xf32>
    %cst_56 = arith.constant dense<0.000000e+00> : vector<8x256xf32>
    %223 = tpu.matmul %19, %222, %cst_56 {dimension_numbers = #tpu.dot_dimension_numbers<[1], [0], [0], [1], [0, 0, 1, 1], [], []>} : vector<8x8xf32>, vector<8x256xf32>, vector<8x256xf32> -> vector<8x256xf32>
    %224 = vector.broadcast %28 : vector<1x256xf32> to vector<8x256xf32>
    %225 = arith.mulf %223, %224 : vector<8x256xf32>
    %226 = arith.addf %219, %225 : vector<8x256xf32>
    %cst_57 = arith.constant 5.000000e-01 : f32
    %227 = vector.broadcast %cst_57 : f32 to vector<8x256xf32>
    %228 = arith.mulf %227, %226 : vector<8x256xf32>
    %cst_58 = arith.constant 0.707106769 : f32
    %229 = vector.broadcast %cst_58 : f32 to vector<8x256xf32>
    %230 = arith.mulf %226, %229 : vector<8x256xf32>
    %231 = math.absf %230 : vector<8x256xf32>
    %cst_59 = arith.constant 0.327591091 : f32
    %232 = vector.broadcast %cst_59 : f32 to vector<8x256xf32>
    %233 = arith.mulf %232, %231 : vector<8x256xf32>
    %cst_60 = arith.constant 1.000000e+00 : f32
    %234 = vector.broadcast %cst_60 : f32 to vector<8x256xf32>
    %235 = arith.addf %234, %233 : vector<8x256xf32>
    %cst_61 = arith.constant 1.000000e+00 : f32
    %236 = vector.broadcast %cst_61 : f32 to vector<8x256xf32>
    %237 = arith.divf %236, %235 : vector<8x256xf32>
    %cst_62 = arith.constant 1.06140542 : f32
    %238 = vector.broadcast %cst_62 : f32 to vector<8x256xf32>
    %239 = arith.mulf %237, %238 : vector<8x256xf32>
    %cst_63 = arith.constant -1.45315206 : f32
    %240 = vector.broadcast %cst_63 : f32 to vector<8x256xf32>
    %241 = arith.addf %240, %239 : vector<8x256xf32>
    %242 = arith.mulf %237, %241 : vector<8x256xf32>
    %cst_64 = arith.constant 1.42141378 : f32
    %243 = vector.broadcast %cst_64 : f32 to vector<8x256xf32>
    %244 = arith.addf %243, %242 : vector<8x256xf32>
    %245 = arith.mulf %237, %244 : vector<8x256xf32>
    %cst_65 = arith.constant -0.284496725 : f32
    %246 = vector.broadcast %cst_65 : f32 to vector<8x256xf32>
    %247 = arith.addf %246, %245 : vector<8x256xf32>
    %248 = arith.mulf %237, %247 : vector<8x256xf32>
    %cst_66 = arith.constant 0.254829586 : f32
    %249 = vector.broadcast %cst_66 : f32 to vector<8x256xf32>
    %250 = arith.addf %249, %248 : vector<8x256xf32>
    %251 = arith.mulf %237, %250 : vector<8x256xf32>
    %cst_67 = arith.constant 0.000000e+00 : f32
    %252 = vector.broadcast %cst_67 : f32 to vector<8x256xf32>
    %253 = arith.subf %252, %231 : vector<8x256xf32>
    %254 = arith.mulf %253, %231 : vector<8x256xf32>
    %255 = math.exp %254 : vector<8x256xf32>
    %256 = arith.mulf %251, %255 : vector<8x256xf32>
    %cst_68 = arith.constant 1.000000e+00 : f32
    %257 = vector.broadcast %cst_68 : f32 to vector<8x256xf32>
    %258 = arith.subf %257, %256 : vector<8x256xf32>
    %cst_69 = arith.constant 0.000000e+00 : f32
    %259 = vector.broadcast %cst_69 : f32 to vector<8x256xf32>
    %260 = arith.cmpf olt, %230, %259 : vector<8x256xf32>
    %cst_70 = arith.constant 0.000000e+00 : f32
    %261 = vector.broadcast %cst_70 : f32 to vector<8x256xf32>
    %262 = arith.subf %261, %258 : vector<8x256xf32>
    %263 = arith.select %260, %262, %258 : vector<8x256xi1>, vector<8x256xf32>
    %cst_71 = arith.constant 1.000000e+00 : f32
    %264 = vector.broadcast %cst_71 : f32 to vector<8x256xf32>
    %265 = arith.addf %264, %263 : vector<8x256xf32>
    %266 = arith.mulf %228, %265 : vector<8x256xf32>
    %cst_72 = arith.constant dense<0.000000e+00> : vector<8x256xf32>
    %267 = tpu.matmul %1, %266, %cst_72 {dimension_numbers = #tpu.dot_dimension_numbers<[1], [0], [0], [1], [0, 0, 1, 1], [], []>} : vector<8x8xf32>, vector<8x256xf32>, vector<8x256xf32> -> vector<8x256xf32>
    %cst_73 = arith.constant 5.000000e-01 : f32
    %268 = vector.broadcast %cst_73 : f32 to vector<8x256xf32>
    %269 = arith.mulf %268, %267 : vector<8x256xf32>
    %cst_74 = arith.constant 0.707106769 : f32
    %270 = vector.broadcast %cst_74 : f32 to vector<8x256xf32>
    %271 = arith.mulf %267, %270 : vector<8x256xf32>
    %272 = math.absf %271 : vector<8x256xf32>
    %cst_75 = arith.constant 0.327591091 : f32
    %273 = vector.broadcast %cst_75 : f32 to vector<8x256xf32>
    %274 = arith.mulf %273, %272 : vector<8x256xf32>
    %cst_76 = arith.constant 1.000000e+00 : f32
    %275 = vector.broadcast %cst_76 : f32 to vector<8x256xf32>
    %276 = arith.addf %275, %274 : vector<8x256xf32>
    %cst_77 = arith.constant 1.000000e+00 : f32
    %277 = vector.broadcast %cst_77 : f32 to vector<8x256xf32>
    %278 = arith.divf %277, %276 : vector<8x256xf32>
    %cst_78 = arith.constant 1.06140542 : f32
    %279 = vector.broadcast %cst_78 : f32 to vector<8x256xf32>
    %280 = arith.mulf %278, %279 : vector<8x256xf32>
    %cst_79 = arith.constant -1.45315206 : f32
    %281 = vector.broadcast %cst_79 : f32 to vector<8x256xf32>
    %282 = arith.addf %281, %280 : vector<8x256xf32>
    %283 = arith.mulf %278, %282 : vector<8x256xf32>
    %cst_80 = arith.constant 1.42141378 : f32
    %284 = vector.broadcast %cst_80 : f32 to vector<8x256xf32>
    %285 = arith.addf %284, %283 : vector<8x256xf32>
    %286 = arith.mulf %278, %285 : vector<8x256xf32>
    %cst_81 = arith.constant -0.284496725 : f32
    %287 = vector.broadcast %cst_81 : f32 to vector<8x256xf32>
    %288 = arith.addf %287, %286 : vector<8x256xf32>
    %289 = arith.mulf %278, %288 : vector<8x256xf32>
    %cst_82 = arith.constant 0.254829586 : f32
    %290 = vector.broadcast %cst_82 : f32 to vector<8x256xf32>
    %291 = arith.addf %290, %289 : vector<8x256xf32>
    %292 = arith.mulf %278, %291 : vector<8x256xf32>
    %cst_83 = arith.constant 0.000000e+00 : f32
    %293 = vector.broadcast %cst_83 : f32 to vector<8x256xf32>
    %294 = arith.subf %293, %272 : vector<8x256xf32>
    %295 = arith.mulf %294, %272 : vector<8x256xf32>
    %296 = math.exp %295 : vector<8x256xf32>
    %297 = arith.mulf %292, %296 : vector<8x256xf32>
    %cst_84 = arith.constant 1.000000e+00 : f32
    %298 = vector.broadcast %cst_84 : f32 to vector<8x256xf32>
    %299 = arith.subf %298, %297 : vector<8x256xf32>
    %cst_85 = arith.constant 0.000000e+00 : f32
    %300 = vector.broadcast %cst_85 : f32 to vector<8x256xf32>
    %301 = arith.cmpf olt, %271, %300 : vector<8x256xf32>
    %cst_86 = arith.constant 0.000000e+00 : f32
    %302 = vector.broadcast %cst_86 : f32 to vector<8x256xf32>
    %303 = arith.subf %302, %299 : vector<8x256xf32>
    %304 = arith.select %301, %303, %299 : vector<8x256xi1>, vector<8x256xf32>
    %cst_87 = arith.constant 1.000000e+00 : f32
    %305 = vector.broadcast %cst_87 : f32 to vector<8x256xf32>
    %306 = arith.addf %305, %304 : vector<8x256xf32>
    %307 = arith.mulf %269, %306 : vector<8x256xf32>
    %308 = arith.addf %169, %307 : vector<8x256xf32>
    %c2_i32 = arith.constant 2 : i32
    %cst_88 = arith.constant dense<0.000000e+00> : vector<8x256xf32>
    %309 = tpu.matmul %11, %308, %cst_88 {dimension_numbers = #tpu.dot_dimension_numbers<[1], [0], [0], [1], [0, 0, 1, 1], [], []>} : vector<8x8xf32>, vector<8x256xf32>, vector<8x256xf32> -> vector<8x256xf32>
    %310 = vector.extract_strided_slice %308 {offsets = [0, 239], sizes = [8, 17], strides = [1, 1]} : vector<8x256xf32> to vector<8x17xf32>
    %311 = vector.extract_strided_slice %308 {offsets = [0, 0], sizes = [8, 239], strides = [1, 1]} : vector<8x256xf32> to vector<8x239xf32>
    %312 = tpu.concatenate %310, %311 in 1 : vector<8x17xf32>, vector<8x239xf32> -> vector<8x256xf32>
    %cst_89 = arith.constant dense<0.000000e+00> : vector<8x256xf32>
    %313 = tpu.matmul %3, %312, %cst_89 {dimension_numbers = #tpu.dot_dimension_numbers<[1], [0], [0], [1], [0, 0, 1, 1], [], []>} : vector<8x8xf32>, vector<8x256xf32>, vector<8x256xf32> -> vector<8x256xf32>
    %314 = vector.broadcast %21 : vector<1x256xf32> to vector<8x256xf32>
    %315 = arith.mulf %313, %314 : vector<8x256xf32>
    %316 = arith.addf %309, %315 : vector<8x256xf32>
    %317 = vector.extract_strided_slice %308 {offsets = [0, 240], sizes = [8, 16], strides = [1, 1]} : vector<8x256xf32> to vector<8x16xf32>
    %318 = vector.extract_strided_slice %308 {offsets = [0, 0], sizes = [8, 240], strides = [1, 1]} : vector<8x256xf32> to vector<8x240xf32>
    %319 = tpu.concatenate %317, %318 in 1 : vector<8x16xf32>, vector<8x240xf32> -> vector<8x256xf32>
    %cst_90 = arith.constant dense<0.000000e+00> : vector<8x256xf32>
    %320 = tpu.matmul %5, %319, %cst_90 {dimension_numbers = #tpu.dot_dimension_numbers<[1], [0], [0], [1], [0, 0, 1, 1], [], []>} : vector<8x8xf32>, vector<8x256xf32>, vector<8x256xf32> -> vector<8x256xf32>
    %321 = vector.broadcast %22 : vector<1x256xf32> to vector<8x256xf32>
    %322 = arith.mulf %320, %321 : vector<8x256xf32>
    %323 = arith.addf %316, %322 : vector<8x256xf32>
    %324 = vector.extract_strided_slice %308 {offsets = [0, 241], sizes = [8, 15], strides = [1, 1]} : vector<8x256xf32> to vector<8x15xf32>
    %325 = vector.extract_strided_slice %308 {offsets = [0, 0], sizes = [8, 241], strides = [1, 1]} : vector<8x256xf32> to vector<8x241xf32>
    %326 = tpu.concatenate %324, %325 in 1 : vector<8x15xf32>, vector<8x241xf32> -> vector<8x256xf32>
    %cst_91 = arith.constant dense<0.000000e+00> : vector<8x256xf32>
    %327 = tpu.matmul %7, %326, %cst_91 {dimension_numbers = #tpu.dot_dimension_numbers<[1], [0], [0], [1], [0, 0, 1, 1], [], []>} : vector<8x8xf32>, vector<8x256xf32>, vector<8x256xf32> -> vector<8x256xf32>
    %328 = vector.broadcast %23 : vector<1x256xf32> to vector<8x256xf32>
    %329 = arith.mulf %327, %328 : vector<8x256xf32>
    %330 = arith.addf %323, %329 : vector<8x256xf32>
    %331 = vector.extract_strided_slice %308 {offsets = [0, 255], sizes = [8, 1], strides = [1, 1]} : vector<8x256xf32> to vector<8x1xf32>
    %332 = vector.extract_strided_slice %308 {offsets = [0, 0], sizes = [8, 255], strides = [1, 1]} : vector<8x256xf32> to vector<8x255xf32>
    %333 = tpu.concatenate %331, %332 in 1 : vector<8x1xf32>, vector<8x255xf32> -> vector<8x256xf32>
    %cst_92 = arith.constant dense<0.000000e+00> : vector<8x256xf32>
    %334 = tpu.matmul %9, %333, %cst_92 {dimension_numbers = #tpu.dot_dimension_numbers<[1], [0], [0], [1], [0, 0, 1, 1], [], []>} : vector<8x8xf32>, vector<8x256xf32>, vector<8x256xf32> -> vector<8x256xf32>
    %335 = vector.broadcast %24 : vector<1x256xf32> to vector<8x256xf32>
    %336 = arith.mulf %334, %335 : vector<8x256xf32>
    %337 = arith.addf %330, %336 : vector<8x256xf32>
    %338 = vector.extract_strided_slice %308 {offsets = [0, 1], sizes = [8, 255], strides = [1, 1]} : vector<8x256xf32> to vector<8x255xf32>
    %339 = vector.extract_strided_slice %308 {offsets = [0, 0], sizes = [8, 1], strides = [1, 1]} : vector<8x256xf32> to vector<8x1xf32>
    %340 = tpu.concatenate %338, %339 in 1 : vector<8x255xf32>, vector<8x1xf32> -> vector<8x256xf32>
    %cst_93 = arith.constant dense<0.000000e+00> : vector<8x256xf32>
    %341 = tpu.matmul %13, %340, %cst_93 {dimension_numbers = #tpu.dot_dimension_numbers<[1], [0], [0], [1], [0, 0, 1, 1], [], []>} : vector<8x8xf32>, vector<8x256xf32>, vector<8x256xf32> -> vector<8x256xf32>
    %342 = vector.broadcast %25 : vector<1x256xf32> to vector<8x256xf32>
    %343 = arith.mulf %341, %342 : vector<8x256xf32>
    %344 = arith.addf %337, %343 : vector<8x256xf32>
    %345 = vector.extract_strided_slice %308 {offsets = [0, 15], sizes = [8, 241], strides = [1, 1]} : vector<8x256xf32> to vector<8x241xf32>
    %346 = vector.extract_strided_slice %308 {offsets = [0, 0], sizes = [8, 15], strides = [1, 1]} : vector<8x256xf32> to vector<8x15xf32>
    %347 = tpu.concatenate %345, %346 in 1 : vector<8x241xf32>, vector<8x15xf32> -> vector<8x256xf32>
    %cst_94 = arith.constant dense<0.000000e+00> : vector<8x256xf32>
    %348 = tpu.matmul %15, %347, %cst_94 {dimension_numbers = #tpu.dot_dimension_numbers<[1], [0], [0], [1], [0, 0, 1, 1], [], []>} : vector<8x8xf32>, vector<8x256xf32>, vector<8x256xf32> -> vector<8x256xf32>
    %349 = vector.broadcast %26 : vector<1x256xf32> to vector<8x256xf32>
    %350 = arith.mulf %348, %349 : vector<8x256xf32>
    %351 = arith.addf %344, %350 : vector<8x256xf32>
    %352 = vector.extract_strided_slice %308 {offsets = [0, 16], sizes = [8, 240], strides = [1, 1]} : vector<8x256xf32> to vector<8x240xf32>
    %353 = vector.extract_strided_slice %308 {offsets = [0, 0], sizes = [8, 16], strides = [1, 1]} : vector<8x256xf32> to vector<8x16xf32>
    %354 = tpu.concatenate %352, %353 in 1 : vector<8x240xf32>, vector<8x16xf32> -> vector<8x256xf32>
    %cst_95 = arith.constant dense<0.000000e+00> : vector<8x256xf32>
    %355 = tpu.matmul %17, %354, %cst_95 {dimension_numbers = #tpu.dot_dimension_numbers<[1], [0], [0], [1], [0, 0, 1, 1], [], []>} : vector<8x8xf32>, vector<8x256xf32>, vector<8x256xf32> -> vector<8x256xf32>
    %356 = vector.broadcast %27 : vector<1x256xf32> to vector<8x256xf32>
    %357 = arith.mulf %355, %356 : vector<8x256xf32>
    %358 = arith.addf %351, %357 : vector<8x256xf32>
    %359 = vector.extract_strided_slice %308 {offsets = [0, 17], sizes = [8, 239], strides = [1, 1]} : vector<8x256xf32> to vector<8x239xf32>
    %360 = vector.extract_strided_slice %308 {offsets = [0, 0], sizes = [8, 17], strides = [1, 1]} : vector<8x256xf32> to vector<8x17xf32>
    %361 = tpu.concatenate %359, %360 in 1 : vector<8x239xf32>, vector<8x17xf32> -> vector<8x256xf32>
    %cst_96 = arith.constant dense<0.000000e+00> : vector<8x256xf32>
    %362 = tpu.matmul %19, %361, %cst_96 {dimension_numbers = #tpu.dot_dimension_numbers<[1], [0], [0], [1], [0, 0, 1, 1], [], []>} : vector<8x8xf32>, vector<8x256xf32>, vector<8x256xf32> -> vector<8x256xf32>
    %363 = vector.broadcast %28 : vector<1x256xf32> to vector<8x256xf32>
    %364 = arith.mulf %362, %363 : vector<8x256xf32>
    %365 = arith.addf %358, %364 : vector<8x256xf32>
    %cst_97 = arith.constant 5.000000e-01 : f32
    %366 = vector.broadcast %cst_97 : f32 to vector<8x256xf32>
    %367 = arith.mulf %366, %365 : vector<8x256xf32>
    %cst_98 = arith.constant 0.707106769 : f32
    %368 = vector.broadcast %cst_98 : f32 to vector<8x256xf32>
    %369 = arith.mulf %365, %368 : vector<8x256xf32>
    %370 = math.absf %369 : vector<8x256xf32>
    %cst_99 = arith.constant 0.327591091 : f32
    %371 = vector.broadcast %cst_99 : f32 to vector<8x256xf32>
    %372 = arith.mulf %371, %370 : vector<8x256xf32>
    %cst_100 = arith.constant 1.000000e+00 : f32
    %373 = vector.broadcast %cst_100 : f32 to vector<8x256xf32>
    %374 = arith.addf %373, %372 : vector<8x256xf32>
    %cst_101 = arith.constant 1.000000e+00 : f32
    %375 = vector.broadcast %cst_101 : f32 to vector<8x256xf32>
    %376 = arith.divf %375, %374 : vector<8x256xf32>
    %cst_102 = arith.constant 1.06140542 : f32
    %377 = vector.broadcast %cst_102 : f32 to vector<8x256xf32>
    %378 = arith.mulf %376, %377 : vector<8x256xf32>
    %cst_103 = arith.constant -1.45315206 : f32
    %379 = vector.broadcast %cst_103 : f32 to vector<8x256xf32>
    %380 = arith.addf %379, %378 : vector<8x256xf32>
    %381 = arith.mulf %376, %380 : vector<8x256xf32>
    %cst_104 = arith.constant 1.42141378 : f32
    %382 = vector.broadcast %cst_104 : f32 to vector<8x256xf32>
    %383 = arith.addf %382, %381 : vector<8x256xf32>
    %384 = arith.mulf %376, %383 : vector<8x256xf32>
    %cst_105 = arith.constant -0.284496725 : f32
    %385 = vector.broadcast %cst_105 : f32 to vector<8x256xf32>
    %386 = arith.addf %385, %384 : vector<8x256xf32>
    %387 = arith.mulf %376, %386 : vector<8x256xf32>
    %cst_106 = arith.constant 0.254829586 : f32
    %388 = vector.broadcast %cst_106 : f32 to vector<8x256xf32>
    %389 = arith.addf %388, %387 : vector<8x256xf32>
    %390 = arith.mulf %376, %389 : vector<8x256xf32>
    %cst_107 = arith.constant 0.000000e+00 : f32
    %391 = vector.broadcast %cst_107 : f32 to vector<8x256xf32>
    %392 = arith.subf %391, %370 : vector<8x256xf32>
    %393 = arith.mulf %392, %370 : vector<8x256xf32>
    %394 = math.exp %393 : vector<8x256xf32>
    %395 = arith.mulf %390, %394 : vector<8x256xf32>
    %cst_108 = arith.constant 1.000000e+00 : f32
    %396 = vector.broadcast %cst_108 : f32 to vector<8x256xf32>
    %397 = arith.subf %396, %395 : vector<8x256xf32>
    %cst_109 = arith.constant 0.000000e+00 : f32
    %398 = vector.broadcast %cst_109 : f32 to vector<8x256xf32>
    %399 = arith.cmpf olt, %369, %398 : vector<8x256xf32>
    %cst_110 = arith.constant 0.000000e+00 : f32
    %400 = vector.broadcast %cst_110 : f32 to vector<8x256xf32>
    %401 = arith.subf %400, %397 : vector<8x256xf32>
    %402 = arith.select %399, %401, %397 : vector<8x256xi1>, vector<8x256xf32>
    %cst_111 = arith.constant 1.000000e+00 : f32
    %403 = vector.broadcast %cst_111 : f32 to vector<8x256xf32>
    %404 = arith.addf %403, %402 : vector<8x256xf32>
    %405 = arith.mulf %367, %404 : vector<8x256xf32>
    %cst_112 = arith.constant dense<0.000000e+00> : vector<8x256xf32>
    %406 = tpu.matmul %1, %405, %cst_112 {dimension_numbers = #tpu.dot_dimension_numbers<[1], [0], [0], [1], [0, 0, 1, 1], [], []>} : vector<8x8xf32>, vector<8x256xf32>, vector<8x256xf32> -> vector<8x256xf32>
    %cst_113 = arith.constant 5.000000e-01 : f32
    %407 = vector.broadcast %cst_113 : f32 to vector<8x256xf32>
    %408 = arith.mulf %407, %406 : vector<8x256xf32>
    %cst_114 = arith.constant 0.707106769 : f32
    %409 = vector.broadcast %cst_114 : f32 to vector<8x256xf32>
    %410 = arith.mulf %406, %409 : vector<8x256xf32>
    %411 = math.absf %410 : vector<8x256xf32>
    %cst_115 = arith.constant 0.327591091 : f32
    %412 = vector.broadcast %cst_115 : f32 to vector<8x256xf32>
    %413 = arith.mulf %412, %411 : vector<8x256xf32>
    %cst_116 = arith.constant 1.000000e+00 : f32
    %414 = vector.broadcast %cst_116 : f32 to vector<8x256xf32>
    %415 = arith.addf %414, %413 : vector<8x256xf32>
    %cst_117 = arith.constant 1.000000e+00 : f32
    %416 = vector.broadcast %cst_117 : f32 to vector<8x256xf32>
    %417 = arith.divf %416, %415 : vector<8x256xf32>
    %cst_118 = arith.constant 1.06140542 : f32
    %418 = vector.broadcast %cst_118 : f32 to vector<8x256xf32>
    %419 = arith.mulf %417, %418 : vector<8x256xf32>
    %cst_119 = arith.constant -1.45315206 : f32
    %420 = vector.broadcast %cst_119 : f32 to vector<8x256xf32>
    %421 = arith.addf %420, %419 : vector<8x256xf32>
    %422 = arith.mulf %417, %421 : vector<8x256xf32>
    %cst_120 = arith.constant 1.42141378 : f32
    %423 = vector.broadcast %cst_120 : f32 to vector<8x256xf32>
    %424 = arith.addf %423, %422 : vector<8x256xf32>
    %425 = arith.mulf %417, %424 : vector<8x256xf32>
    %cst_121 = arith.constant -0.284496725 : f32
    %426 = vector.broadcast %cst_121 : f32 to vector<8x256xf32>
    %427 = arith.addf %426, %425 : vector<8x256xf32>
    %428 = arith.mulf %417, %427 : vector<8x256xf32>
    %cst_122 = arith.constant 0.254829586 : f32
    %429 = vector.broadcast %cst_122 : f32 to vector<8x256xf32>
    %430 = arith.addf %429, %428 : vector<8x256xf32>
    %431 = arith.mulf %417, %430 : vector<8x256xf32>
    %cst_123 = arith.constant 0.000000e+00 : f32
    %432 = vector.broadcast %cst_123 : f32 to vector<8x256xf32>
    %433 = arith.subf %432, %411 : vector<8x256xf32>
    %434 = arith.mulf %433, %411 : vector<8x256xf32>
    %435 = math.exp %434 : vector<8x256xf32>
    %436 = arith.mulf %431, %435 : vector<8x256xf32>
    %cst_124 = arith.constant 1.000000e+00 : f32
    %437 = vector.broadcast %cst_124 : f32 to vector<8x256xf32>
    %438 = arith.subf %437, %436 : vector<8x256xf32>
    %cst_125 = arith.constant 0.000000e+00 : f32
    %439 = vector.broadcast %cst_125 : f32 to vector<8x256xf32>
    %440 = arith.cmpf olt, %410, %439 : vector<8x256xf32>
    %cst_126 = arith.constant 0.000000e+00 : f32
    %441 = vector.broadcast %cst_126 : f32 to vector<8x256xf32>
    %442 = arith.subf %441, %438 : vector<8x256xf32>
    %443 = arith.select %440, %442, %438 : vector<8x256xi1>, vector<8x256xf32>
    %cst_127 = arith.constant 1.000000e+00 : f32
    %444 = vector.broadcast %cst_127 : f32 to vector<8x256xf32>
    %445 = arith.addf %444, %443 : vector<8x256xf32>
    %446 = arith.mulf %408, %445 : vector<8x256xf32>
    %447 = arith.addf %308, %446 : vector<8x256xf32>
    %c0_128 = arith.constant 0 : index
    %c0_129 = arith.constant 0 : index
    %c0_130 = arith.constant 0 : index
    %448 = vector.load %arg5[%c0_128, %c0_129, %c0_130] : memref<1x8x256xf32, #tpu.memory_space<vmem>>, vector<1x8x256xf32>
    %449 = vector.shape_cast %448 : vector<1x8x256xf32> to vector<8x256xf32>
    %450 = vector.shape_cast %447 : vector<8x256xf32> to vector<1x8x256xf32>
    tpu.vector_store %arg5[%c0_128, %c0_129, %c0_130], %450 {strides = array<i32>} : memref<1x8x256xf32, #tpu.memory_space<vmem>>, vector<1x8x256xf32>,
    return
  }
  func.func @transform_0(%arg0: i32) -> (i32, i32) {
    %c0_i32 = arith.constant 0 : i32
    %c0_i32_0 = arith.constant 0 : i32
    %c0_i32_1 = arith.constant 0 : i32
    return %c0_i32, %c0_i32_0 : i32, i32
  }
  func.func @transform_1(%arg0: i32) -> (i32, i32, i32) {
    %c0_i32 = arith.constant 0 : i32
    %c0_i32_0 = arith.constant 0 : i32
    %c0_i32_1 = arith.constant 0 : i32
    return %arg0, %c0_i32, %c0_i32_0 : i32, i32, i32
  }
  func.func @transform_2(%arg0: i32) -> (i32, i32, i32) {
    %c0_i32 = arith.constant 0 : i32
    %c0_i32_0 = arith.constant 0 : i32
    %c0_i32_1 = arith.constant 0 : i32
    %c0_i32_2 = arith.constant 0 : i32
    return %c0_i32, %c0_i32_0, %c0_i32_1 : i32, i32, i32
  }
  func.func @transform_3(%arg0: i32) -> (i32, i32) {
    %c0_i32 = arith.constant 0 : i32
    %c0_i32_0 = arith.constant 0 : i32
    %c0_i32_1 = arith.constant 0 : i32
    return %c0_i32, %c0_i32_0 : i32, i32
  }
  func.func @transform_4(%arg0: i32) -> (i32, i32, i32) {
    %c0_i32 = arith.constant 0 : i32
    %c0_i32_0 = arith.constant 0 : i32
    %c0_i32_1 = arith.constant 0 : i32
    return %arg0, %c0_i32, %c0_i32_0 : i32, i32, i32
  }
}

</mosaic_0001>

<bundles_post_ra>
// kernel: tpu_custom_call.1
= control target key start
LH: loop header
LB: loop body
LE: loop exit
PB: predicated region body
PF: predicated region fallthrough
CT: control target
= control target key end

     0   :  { %9 = vsyncpa [#allocation3], 0  ;;  %s4312_s0 = inlined_call_operand.hbm [shape: f32[9,256], index: 0, kind: input, shape index: {}]   ;;  %s4313_s1 = inlined_call_operand.hbm [shape: f32[2,8,256], index: 1, kind: input, shape index: {}]   ;;  %s4314_s2 = inlined_call_operand.hbm [shape: f32[9,8,8], index: 2, kind: input, shape index: {}]   ;;  %s4315_s3 = inlined_call_operand.hbm [shape: f32[8,8], index: 3, kind: input, shape index: {}]   ;;  %s4316_s4 = inlined_call_operand.hbm [shape: f32[2,8,256], index: 4, kind: output, shape index: {}]  }
   0x1   :  { %10 = vsyncpa [#allocation6], 0 }
   0x2   :  { %12 = vsyncpa [#allocation6 + $0x1], 0 }
   0x3   :  { %13 = vsyncpa [#allocation9], 0 }
   0x4   :  { %14 = vsyncpa [#allocation4], 0 }
   0x5   :  { %16 = vsyncpa [#allocation4 + $0x1], 0  ;;  %s3705_s15 = smov 0   ;;  %s3707_s16 = smov 0  }
   0x6   :  { %s3709_s17 = smov 0   ;;  %s3711_s18 = smov 0  }
   0x7 LB: > { %s3726_s19 = sadd.s32 4294967295, %s3660_s18   ;;  %s3265_s20 = sadd.s32 4294967294, %s3660_s18   ;;  %s3660_s18 = sphi %s3711_s18, %s4341_s18   ;;  %s3656_s17 = sphi %s3709_s17, %s4340_s17   ;;  %s3652_s16 = sphi %s3707_s16, %s4339_s16   ;;  %s3648_s15 = sphi %s3705_s15, %s4338_s15  }
   0x8   : > { %p63_p0 = scmp.ne.s32.totalorder %s3652_s16, %s3648_s15  ;;  %p4317_p1 = scmp.eq.s32.totalorder %s3726_s19, 0 }
   0x9   : > { %p135_p3 = scmp.eq.s32.totalorder %s3265_s20, 1  ;;  %p3266_p5 = scmp.ge.s32.totalorder %s3660_s18, 1 }
   0xa   : > { %p3735_p4 = por %p4317_p1, %p63_p0  ;;  %p142_p7 = scmp.lt.s32.totalorder %s3660_s18, 3 }
   0xb   : > { %p3740_p6 = por %p135_p3, %p63_p0  ;;  %s3662_s24 = smov [#allocation7]  }
   0xc   : > { %s4320_s21 = scalar_select %p3735_p4, 1, 0 }
   0xd   : > { %s4321_s22 = scalar_select %p3740_p6, 1, 0 }
   0xe   : > { %p3745_p8 = pnand %p3266_p5, %p142_p7  ;;  %s167_s25 = sshll.u32 %s3662_s24, 4  ;;  %s3749_s25 = int_to_ptr.vmem [resolvable:$true] %s167_s25 }
   0xf   : > { %s3663_s27 = smov [#allocation2]   ;;  %s3468_s5 = scalar_lea.hbm %s4314_s2, 1152 }
  0x10   : > { %s4322_s23 = scalar_select %p3745_p8, 1, 0 }
  0x11   : > { %p3335_p9 = pneg %p3745_p8  ;;  %s154_s28 = sshll.u32 %s3663_s27, 4  ;;  %s3760_s28 = int_to_ptr.vmem [resolvable:$true] %s154_s28 }
  0x12   : > { %p3469_p12 = scmp.ne.s32.totalorder %s4314_s2, %s3468_s5  ;;  %p3475_p5 = scmp.lt.u32.totalorder %s3468_s5, %s4314_s2 }
  0x13   : > { %p3756_p11 = pnand %p3335_p9, %p4317_p1 }
  0x15   : > { %p3770_p13 = pneg %p3756_p11 }
  0x17   : > { %p3471_p0 = pnand %p3770_p13, %p3469_p12 }
  0x19   : > { %p3472_p3 = pneg %p3471_p0 }
  0x1b   : > { %p3477_p7 = pnand %p3475_p5, %p3472_p3 }
  0x1d   : > { %3480 = shalt.err (!%p3477_p7)
}
  0x1e   : > { %s3481_s11 = scalar_lea.vmem %s3749_s25, 1152  ;;  %p3489_p2 = scmp.lt.s32.totalorder %s3749_s25, %s3749_s25 }
  0x1f   : > { %p3482_p9 = scmp.ne.s32.totalorder %s3749_s25, %s3481_s11  ;;  %p3490_p6 = scmp.lt.s32.totalorder %s3481_s11, %s3481_s11 }
  0x21   : > { %p3484_p10 = pnand %p3482_p9, %p3770_p13  ;;  %p3491_p12 = por %p3490_p6, %p3489_p2 }
  0x23   : > { %p3485_p1 = pneg %p3484_p10 }
  0x25   : > { %p3492_p0 = pnand %p3491_p12, %p3485_p1 }
  0x27   : > { %3495 = shalt.err (!%p3492_p0)
}
  0x28   : > { %s3664_s12 = smov 128   ;;  %s3665_s13 = smov 8  }
  0x29   : > { %3341 = dma.hbm_to_vmem [thread:$0]  (!%p3756_p11), %s4314_s2, 1152, %s3749_s25, [#allocation6], %s3664_s12, %s3664_s12, %s3665_s13  }
  0x2a   : > { %s3496_s29 = scalar_lea.hbm %s4312_s0, 512 }
  0x2b   : > { %p3497_p2 = scmp.ne.s32.totalorder %s4312_s0, %s3496_s29  ;;  %p3503_p10 = scmp.lt.u32.totalorder %s3496_s29, %s4312_s0 }
  0x2d   : > { %p3499_p1 = pnand %p3497_p2, %p3770_p13 }
  0x2f   : > { %p3500_p6 = pneg %p3499_p1 }
  0x31   : > { %p3505_p3 = pnand %p3503_p10, %p3500_p6 }
  0x33   : > { %3508 = shalt.err (!%p3505_p3)
}
  0x34   : > { %s3509_s25 = scalar_lea.vmem %s3760_s28, 512  ;;  %p3517_p12 = scmp.lt.s32.totalorder %s3760_s28, %s3760_s28 }
  0x35   : > { %p3510_p5 = scmp.ne.s32.totalorder %s3760_s28, %s3509_s25  ;;  %p3518_p0 = scmp.lt.s32.totalorder %s3509_s25, %s3509_s25 }
  0x37   : > { %p3512_p7 = pnand %p3510_p5, %p3770_p13  ;;  %p3519_p2 = por %p3518_p0, %p3517_p12 }
  0x39   : > { %p3513_p9 = pneg %p3512_p7 }
  0x3b   : > { %p3520_p1 = pnand %p3519_p2, %p3513_p9 }
  0x3d   : > { %3523 = shalt.err (!%p3520_p1)
}
  0x3e   : > { %s3666_s9 = smov 256   ;;  %s3667_s10 = smov 16  }
  0x3f   : > { %3338 = dma.hbm_to_vmem [thread:$0]  (!%p3756_p11), %s4312_s0, 512, %s3760_s28, [#allocation3], %s3666_s9, %s3666_s9, %s3667_s10  }
  0x40   : > { %s3668_s13 = smov [#allocation8]   ;;  %s3815_s20 = sadd.s32 1, %s3660_s18  }
  0x41   : > { %s181_s14 = sshll.u32 %s3668_s13, 4  ;;  %s3524_s29 = scalar_lea.hbm %s4315_s3, 128  ;;  %s182_s14 = int_to_ptr.vmem [resolvable:$true] %s181_s14 }
  0x42   : > { %p3525_p6 = scmp.ne.s32.totalorder %s4315_s3, %s3524_s29  ;;  %p3531_p5 = scmp.lt.u32.totalorder %s3524_s29, %s4315_s3 }
  0x44   : > { %p3527_p10 = pnand %p3525_p6, %p3770_p13 }
  0x46   : > { %p3528_p3 = pneg %p3527_p10 }
  0x48   : > { %p3533_p7 = pnand %p3531_p5, %p3528_p3 }
  0x4a   : > { %3536 = shalt.err (!%p3533_p7)
}
  0x4b   : > { %s3537_s28 = scalar_lea.vmem %s182_s14, 128  ;;  %p3545_p2 = scmp.lt.s32.totalorder %s182_s14, %s182_s14 }
  0x4c   : > { %p3538_p9 = scmp.ne.s32.totalorder %s182_s14, %s3537_s28  ;;  %p3546_p1 = scmp.lt.s32.totalorder %s3537_s28, %s3537_s28 }
  0x4e   : > { %p3540_p12 = pnand %p3538_p9, %p3770_p13  ;;  %p3547_p4 = por %p3546_p1, %p3545_p2 }
  0x50   : > { %p3541_p0 = pneg %p3540_p12 }
  0x52   : > { %p3548_p8 = pnand %p3547_p4, %p3541_p0 }
  0x54   : > { %3551 = shalt.err (!%p3548_p8)
}
  0x55   : > { %3344 = dma.hbm_to_vmem [thread:$0]  (!%p3756_p11), %s4315_s3, 128, %s182_s14, [#allocation9]  }
  0x56   : > { %s47_s8 = ssub.s32 %s3660_s18, %s3815_s20  ;;  %s50_s10 = sadd.s32 1, %s3656_s17 }
  0x57   : > { %p48_p4 = scmp.eq.s32.totalorder %s47_s8, 0  ;;  %p57_p8 = scmp.ne.s32.totalorder %s3656_s17, %s3652_s16 }
  0x58   : > { %p58_p13 = scmp.eq.s32.totalorder %s3660_s18, 0  ;;  %p3356_p6 = scmp.lt.s32.totalorder %s3660_s18, 2 }
  0x59   : > { %s3843_s26 = scalar_select %p48_p4, %s3656_s17, %s50_s10  }
  0x5a   : > { %p59_p10 = por %p58_p13, %p57_p8  ;;  %p4325_p3 = scmp.eq.s32.totalorder %s3726_s19, 1 }
  0x5b   : > { %s192_s12 = sand.u32 1, %s3660_s18   ;;  %s194_s13 = sand.u32 1, %s3656_s17  }
  0x5c   : > { %p3847_p5 = por %p4325_p3, %p57_p8  ;;  %s3271_s24 = sshll.u32 %s194_s13, 4 }
  0x5d   : > { %s3317_s27 = sshll.u32 %s3660_s18, 8  ;;  %s196_s5 = scalar_lea.vmem [#allocation5], %s3271_s24 }
  0x5e   : > { %s3857_s30 = scalar_lea.hbm %s4313_s1, %s3317_s27  ;;  %s204_s6 = sshll.u32 %s196_s5, 4  ;;  %s3859_s6 = int_to_ptr.vmem [resolvable:$true] %s204_s6 }
  0x5f   : > { %p3861_p11 = pnand %p3356_p6, %p59_p10  ;;  %s193_s28 = scalar_lea.sflag [#allocation6], %s192_s12 }
  0x60   : > { %s3552_s25 = scalar_lea.hbm %s3857_s30, 256  ;;  %s3557_s10 = scalar_lea.hbm %s4313_s1, 512 }
  0x61   : > { %p3553_p7 = scmp.ne.s32.totalorder %s3857_s30, %s3552_s25  ;;  %p3554_p9 = pneg %p3861_p11 }
  0x62   : > { %p3558_p2 = scmp.lt.u32.totalorder %s3857_s30, %s4313_s1  ;;  %p3559_p1 = scmp.lt.u32.totalorder %s3557_s10, %s3552_s25 }
  0x63   : > { %p3555_p12 = pnand %p3554_p9, %p3553_p7  ;;  %p3561_p8 = scmp.lt.u32.totalorder %s3552_s25, %s3857_s30 }
  0x64   : > { %p3560_p4 = por %p3559_p1, %p3558_p2 }
  0x65   : > { %p3556_p0 = pneg %p3555_p12 }
  0x66   : > { %p3562_p13 = por %p3561_p8, %p3560_p4 }
  0x68   : > { %p3563_p6 = pnand %p3562_p13, %p3556_p0 }
  0x6a   : > { %3566 = shalt.err (!%p3563_p6)
}
  0x6b   : > { %s3567_s12 = scalar_lea.vmem %s3859_s6, 256  ;;  %s3669_s27 = smov [#allocation5]  }
  0x6c   : > { %p3568_p10 = scmp.ne.s32.totalorder %s3859_s6, %s3567_s12  ;;  %s3572_s29 = sshll.u32 %s3669_s27, 4  ;;  %s3573_s29 = int_to_ptr.vmem [resolvable:$false] %s3572_s29 }
  0x6d   : > { %s3574_s14 = scalar_lea.vmem %s3573_s29, 512  ;;  %p3575_p12 = scmp.lt.s32.totalorder %s3859_s6, %s3573_s29 }
  0x6e   : > { %p3570_p3 = pnand %p3568_p10, %p3554_p9  ;;  %p3576_p2 = scmp.lt.s32.totalorder %s3574_s14, %s3567_s12 }
  0x70   : > { %p3571_p7 = pneg %p3570_p3  ;;  %p3577_p1 = por %p3576_p2, %p3575_p12 }
  0x72   : > { %p3578_p4 = pnand %p3577_p1, %p3571_p7 }
  0x74   : > { %3581 = shalt.err (!%p3578_p4)
}
  0x75   : > { %3348 = dma.hbm_to_vmem [thread:$0]  (!%p3861_p11), %s3857_s30, 256, %s3859_s6, %s193_s28  }
  0x76   : > { %p4328_p0 = scmp.ne.s32.totalorder %s4322_s23, 0 }
  0x77   : > { %p4329_p9 = scmp.eq.s32.totalorder (!%p4328_p0), %s3726_s19, 0 }
  0x78   : > { %213 = sbr.rel (%p4328_p0) target bundleno = 2181 (0x885), region = 36 }
  0x7f   : > { %3627 = dma.done.wait (%p4329_p9), [#allocation3], 512   ;;  %p4330_p8 = pmov %p4329_p9 }
  0x80   : > { %s219_s5 = sand.u32 1, %s3726_s19   ;;  %s221_s25 = sand.u32 1, %s3652_s16  }
  0x81   : > { %3629 = vsyncadd (%p4330_p8), [#allocation3], 4294966784  ;;  %s3900_s7 = sshll.u32 %s221_s25, 4  ;;  %s220_s30 = scalar_lea.sflag [#allocation6], %s219_s5 }
  0x82   : > { %s223_s6 = scalar_lea.vmem [#allocation5], %s3900_s7  ;;  %p4331_p11 = scmp.ne.s32.totalorder %s4320_s21, 0 }
  0x84   : > { %3631 = dma.done.wait (%p4331_p11), %s220_s30, 256  }
  0x85   : > { %3633 = vsyncadd (%p4331_p11), %s220_s30, 4294967040  ;;  %p4332_p13 = pmov %p4330_p8 }
  0x86   : > { %p4333_p6 = pmov %p4330_p8 }
  0x87   : > { %3635 = dma.done.wait (%p4332_p13), [#allocation6], 1152  }
  0x88   : > { %3637 = vsyncadd (%p4333_p6), [#allocation6], 4294966144  ;;  %p4334_p10 = pmov %p4333_p6 }
  0x89   : > { %p4335_p3 = pmov %p4333_p6 }
  0x8a   : > { %3639 = dma.done.wait (%p4334_p10), [#allocation9], 128  }
  0x8b   : > { %3641 = vsyncadd (%p4335_p3), [#allocation9], 4294967168  ;;  %v3670_v0 = vmov 0.0   ;;  %v3917_v1 = vld [vmem:[%s223_s6 + $0x8] sm:$0xff]  ;;  %s3671_s21 = smov 16   ;;  %s3672_s23 = smov 17   ;;  %v359_v46 = vlaneseq }
  0x8c   : > { %352 = vmatprep.mubr.f32.mxu0 %v3670_v0  ;;  %436 = vmatprep.mubr.f32.mxu1 %v3670_v0  ;;  %v3923_v2 = vld [vmem:[#allocation7 + $0x20] sm:$0xff]  ;;  %vm284_vm0 = vcmask 64512   ;;  %s3673_s28 = smov 15   ;;  %s3674_s9 = smov 1   ;;  %vm279_vm1 = vcmask 138240   ;;  %vm448_vm2 = vcmask 130048  }
  0x8d   : > { %443 = vrot.lane.b32.xlu1 %v3917_v1, %s3671_s21  ;;  %273 = vrot.lane.b32.xlu0 %v3917_v1, %s3672_s23  ;;  %v3925_v3 = vld [vmem:[%s223_s6] sm:$0xff]  ;;  %s3675_s8 = smov 127   ;;  %s3676_s10 = smov 113   ;;  %vm544_vm3 = vcmask 121856   ;;  %v3971_v17 = vld [vmem:[#allocation7 + $0x8] sm:$0xff]  ;;  %vm640_vm4 = vcmask 7168  }
  0x8e   : > { %372 = vmatprep.subr.mxu1 %v3917_v1  ;;  %s3677_s13 = smov 112   ;;  %s3678_s24 = smov 111   ;;  %v3962_v10 = vld [vmem:[#allocation7] sm:$0xff]  ;;  %v3973_v18 = vld [vmem:[#allocation7 + $0x10] sm:$0xff]  ;;  %v3982_v23 = vld [vmem:[#allocation7 + $0x18] sm:$0xff]  ;;  %vm735_vm5 = vcmask 1039360  }
  0x8f   : > { %373 = vmatpush1.msra.mxu1 %v3925_v3  ;;  %v3989_v28 = vld [vmem:[#allocation7 + $0x28] sm:$0xff]  ;;  %vm831_vm6 = vcmask 924672   ;;  %v3996_v33 = vld [vmem:[#allocation7 + $0x30] sm:$0xff]  ;;  %vm927_vm7 = vcmask 916480   ;;  %v4003_v38 = vld [vmem:[#allocation7 + $0x38] sm:$0xff]  ;;  %vm1023_vm8 = vcmask 908288  }
  0x90   : > { %3281 = vmatmul.mubr.msk.f32.vlgmr.msra.gmra.mrb[0].mxu1 %vm284_vm0, %v3923_v2  ;;  %v4010_v43 = vld [vmem:[#allocation7 + $0x40] sm:$0xff]  ;;  %v360_v47 = vshrl.u32 %v359_v46, 7  ;;  %v267_v50 = vld [vmem:[#allocation2 + $0x8] sm:$0xff]  ;;  %s3318_s12 = sshll.u32 %s3726_s19, 8  ;;  %s255_s27 = scalar_lea.vmem [#allocation10], %s3900_s7 }
  0x91   : > { %446 = vrot.lane.b32.xlu1 %v3925_v3, %s3671_s21  ;;  %277 = vrot.lane.b32.xlu0 %v3925_v3, %s3672_s23  ;;  %v266_v49 = vld [vmem:[#allocation2] sm:$0xff]  ;;  %s3164_s29 = sshll.u32 %s255_s27, 4  ;;  %s4267_s30 = scalar_lea.hbm %s4316_s4, %s3318_s12  ;;  %s4269_s29 = int_to_ptr.vmem [resolvable:$true] %s3164_s29 }
  0x92   : > { %616 = vmatprep.mubr.f32.mxu1 %v3670_v0  ;;  %v361_v48 = vsub.s32 0, %v360_v47  ;;  %v529_v52 = vsub.s32 1, %v360_v47  ;;  %v625_v53 = vsub.s32 2, %v360_v47  ;;  %v721_v60 = vsub.s32 3, %v360_v47  ;;  %s3150_s19 = scalar_lea.sflag [#allocation4], %s221_s25  ;;  %s3582_s7 = scalar_lea.vmem %s4269_s29, 256 }
  0x93   : > { %p3583_p7 = scmp.ne.s32.totalorder %s4269_s29, %s3582_s7  ;;  %s3679_s6 = smov [#allocation10]  }
  0x94   : > { %v4016_v51 = vrot.slane %v266_v49, %v361_v48  ;;  %v4018_v54 = vrot.slane %v267_v50, %v361_v48  ;;  %v4021_v58 = vrot.slane %v266_v49, %v529_v52  ;;  %v4023_v59 = vrot.slane %v266_v49, %v625_v53 }
  0x95   : > { %542 = vrot.lane.b32.xlu1 %v3925_v3, %s3673_s28  ;;  %539 = vrot.lane.b32.xlu0 %v3917_v1, %s3673_s28  ;;  %v4026_v62 = vrot.slane %v267_v50, %v529_v52  ;;  %v4028_v63 = vrot.slane %v267_v50, %v625_v53  ;;  %p3584_p12 = pnand %p3583_p7, %p3847_p5 }
  0x97   : > { %p3585_p2 = pneg %p3584_p12 }
  0x99   : > { %638 = vrot.lane.b32.xlu1 %v3925_v3, %s3674_s9  ;;  %635 = vrot.lane.b32.xlu0 %v3917_v1, %s3674_s9 }
  0x9d   : > { %733 = vrot.lane.b32.xlu1 %v3917_v1, %s3675_s8  ;;  %731 = vrot.lane.b32.xlu0 %v3925_v3, %s3675_s8 }
  0xa1   : > { %829 = vrot.lane.b32.xlu1 %v3917_v1, %s3676_s10  ;;  %827 = vrot.lane.b32.xlu0 %v3925_v3, %s3676_s10 }
  0xa5   : > { %925 = vrot.lane.b32.xlu1 %v3917_v1, %s3677_s13  ;;  %923 = vrot.lane.b32.xlu0 %v3925_v3, %s3677_s13 }
  0xa9   : > { %1021 = vrot.lane.b32.xlu1 %v3917_v1, %s3678_s24  ;;  %1019 = vrot.lane.b32.xlu0 %v3925_v3, %s3678_s24 }
  0xff   : > { %v444_v4 = vpop.permute.xlu1 %443  ;;  %v274_v5 = vpop.permute.xlu0 %273 }
 0x103   : > { %v447_v6 = vpop.permute.xlu1 %446  ;;  %v278_v7 = vpop.permute.xlu0 %277 }
 0x104   : > { %v280_v8 = vsel %vm279_vm1, %v278_v7, %v274_v5  ;;  %v283_v9 = vsel %vm279_vm1, %v274_v5, %v278_v7  ;;  %v449_v11 = vsel %vm448_vm2, %v447_v6, %v444_v4  ;;  %v452_v12 = vsel %vm448_vm2, %v444_v4, %v447_v6 }
 0x105   : > { %288 = vmatprep.subr.mxu0 %v280_v8 }
 0x106   : > { %289 = vmatpush1.msra.mxu0 %v283_v9 }
 0x107   : > { %v543_v13 = vpop.permute.xlu1 %542  ;;  %456 = vmatprep.subr.mxu0 %v449_v11  ;;  %v540_v14 = vpop.permute.xlu0 %539  ;;  %3280 = vmatmul.mubr.msk.f32.vlgmr.msra.gmra.mrb[0].mxu0 %vm284_vm0, %v3962_v10 }
 0x108   : > { %v548_v15 = vsel %vm544_vm3, %v540_v14, %v543_v13  ;;  %457 = vmatpush1.msra.mxu0 %v452_v12  ;;  %v545_v16 = vsel %vm544_vm3, %v543_v13, %v540_v14  ;;  %520 = vmatprep.mubr.f32.mxu0 %v3670_v0  ;;  %v4032_v13 = vrot.slane %v266_v49, %v721_v60  ;;  %v817_v14 = vsub.s32 5, %v360_v47 }
 0x109   : > { %552 = vmatprep.subr.mxu1 %v545_v16 }
 0x10a   : > { %553 = vmatpush1.msra.mxu1 %v548_v15 }
 0x10b   : > { %v639_v19 = vpop.permute.xlu1 %638  ;;  %v636_v20 = vpop.permute.xlu0 %635  ;;  %3282 = vmatmul.mubr.msk.f32.vlgmr.msra.gmra.mrb[2].mxu0 %vm284_vm0, %v3971_v17  ;;  %3283 = vmatmul.mubr.msk.f32.vlgmr.msra.gmra.mrb[2].mxu1 %vm284_vm0, %v3973_v18 }
 0x10c   : > { %v644_v21 = vsel %vm640_vm4, %v636_v20, %v639_v19  ;;  %v641_v22 = vsel %vm640_vm4, %v639_v19, %v636_v20  ;;  %712 = vmatprep.mubr.f32.mxu0 %v3670_v0  ;;  %808 = vmatprep.mubr.f32.mxu1 %v3670_v0  ;;  %v4036_v19 = vrot.slane %v267_v50, %v721_v60 }
 0x10d   : > { %648 = vmatprep.subr.mxu0 %v641_v22 }
 0x10e   : > { %649 = vmatpush1.msra.mxu0 %v644_v21 }
 0x10f   : > { %v734_v24 = vpop.permute.xlu1 %733  ;;  %v732_v25 = vpop.permute.xlu0 %731  ;;  %3284 = vmatmul.mubr.msk.f32.vlgmr.msra.gmra.mrb[4].mxu0 %vm284_vm0, %v3982_v23 }
 0x110   : > { %v736_v26 = vsel %vm735_vm5, %v732_v25, %v734_v24  ;;  %v740_v27 = vsel %vm735_vm5, %v734_v24, %v732_v25  ;;  %904 = vmatprep.mubr.f32.mxu0 %v3670_v0 }
 0x111   : > { %744 = vmatprep.subr.mxu1 %v740_v27  ;;  %v4039_v27 = vrot.slane %v266_v49, %v817_v14 }
 0x112   : > { %745 = vmatpush1.msra.mxu1 %v736_v26 }
 0x113   : > { %v830_v29 = vpop.permute.xlu1 %829  ;;  %v828_v30 = vpop.permute.xlu0 %827  ;;  %3285 = vmatmul.mubr.msk.f32.vlgmr.msra.gmra.mrb[4].mxu1 %vm284_vm0, %v3989_v28 }
 0x114   : > { %v832_v31 = vsel %vm831_vm6, %v828_v30, %v830_v29  ;;  %v836_v32 = vsel %vm831_vm6, %v830_v29, %v828_v30  ;;  %1000 = vmatprep.mubr.f32.mxu1 %v3670_v0  ;;  %v913_v29 = vsub.s32 6, %v360_v47 }
 0x115   : > { %840 = vmatprep.subr.mxu0 %v836_v32  ;;  %v4042_v32 = vrot.slane %v267_v50, %v817_v14 }
 0x116   : > { %841 = vmatpush1.msra.mxu0 %v832_v31 }
 0x117   : > { %v926_v34 = vpop.permute.xlu1 %925  ;;  %v924_v35 = vpop.permute.xlu0 %923  ;;  %3286 = vmatmul.mubr.msk.f32.vlgmr.msra.gmra.mrb[6].mxu0 %vm284_vm0, %v3996_v33 }
 0x118   : > { %v928_v36 = vsel %vm927_vm7, %v924_v35, %v926_v34  ;;  %v932_v37 = vsel %vm927_vm7, %v926_v34, %v924_v35  ;;  %1096 = vmatprep.mubr.f32.mxu0 %v3670_v0 }
 0x119   : > { %936 = vmatprep.subr.mxu1 %v932_v37 }
 0x11a   : > { %937 = vmatpush1.msra.mxu1 %v928_v36 }
 0x11b   : > { %v1022_v39 = vpop.permute.xlu1 %1021  ;;  %v1020_v40 = vpop.permute.xlu0 %1019  ;;  %3287 = vmatmul.mubr.msk.f32.vlgmr.msra.gmra.mrb[6].mxu1 %vm284_vm0, %v4003_v38 }
 0x11c   : > { %v1024_v41 = vsel %vm1023_vm8, %v1020_v40, %v1022_v39  ;;  %v1028_v42 = vsel %vm1023_vm8, %v1022_v39, %v1020_v40  ;;  %1236 = vmatprep.mubr.f32.mxu1 %v3670_v0  ;;  %v4045_v40 = vrot.slane %v266_v49, %v913_v29 }
 0x11d   : > { %1032 = vmatprep.subr.mxu0 %v1028_v42 }
 0x11e   : > { %1033 = vmatpush1.msra.mxu0 %v1024_v41  ;;  %v1009_v41 = vsub.s32 7, %v360_v47 }
 0x11f   : > { %3288 = vmatmul.mubr.msk.f32.vlgmr.msra.gmra.mrb[8].mxu0 %vm284_vm0, %v4010_v43 }
 0x120   : > { %1374 = vmatprep.mubr.f32.mxu0 %v3670_v0 }
 0x163   : > { %v438_v44 = vpop.f32.mrb[0].mxu1 }
 0x164   : > { %v440_v45 = vpop.f32.mrb[1].mxu1 }
 0x1da   : > { %v354_v55 = vpop.f32.mrb[0].mxu0 }
 0x1db   : > { %v367_v56 = vmul.f32 %v4016_v51, %v354_v55  ;;  %v356_v57 = vpop.f32.mrb[1].mxu0  ;;  %v4051_v55 = vrot.slane %v266_v49, %v1009_v41 }
 0x1dc   : > { %v368_v61 = vmul.f32 %v4018_v54, %v356_v57  ;;  %v4054_v57 = vrot.slane %v267_v50, %v1009_v41 }
 0x1dd   : > { %v439_v4 = vadd.f32 %v438_v44, %v367_v56  ;;  %v4048_v44 = vrot.slane %v267_v50, %v913_v29 }
 0x1de   : > { %v522_v5 = vpop.f32.mrb[2].mxu0  ;;  %v441_v6 = vadd.f32 %v440_v45, %v368_v61  ;;  %v618_v7 = vpop.f32.mrb[2].mxu1 }
 0x1df   : > { %v535_v8 = vmul.f32 %v4021_v58, %v522_v5  ;;  %v524_v9 = vpop.f32.mrb[3].mxu0  ;;  %v631_v11 = vmul.f32 %v4023_v59, %v618_v7  ;;  %v620_v12 = vpop.f32.mrb[3].mxu1  ;;  %v4058_v7 = vld [vmem:[#allocation2 + $0x10] ss:$0 sm:$0xff] }
 0x1e0   : > { %v536_v15 = vmul.f32 %v4026_v62, %v524_v9  ;;  %v632_v16 = vmul.f32 %v4028_v63, %v620_v12  ;;  %v4060_v9 = vld [vmem:[#allocation2 + $0x18] ss:$0 sm:$0xff] }
 0x1e1   : > { %v537_v20 = vadd.f32 %v535_v8, %v439_v4 }
 0x1e2   : > { %v538_v21 = vadd.f32 %v536_v15, %v441_v6  ;;  %v714_v22 = vpop.f32.mrb[4].mxu0 }
 0x1e3   : > { %v633_v24 = vadd.f32 %v631_v11, %v537_v20  ;;  %v727_v25 = vmul.f32 %v4032_v13, %v714_v22  ;;  %v716_v26 = vpop.f32.mrb[5].mxu0 }
 0x1e4   : > { %v634_v30 = vadd.f32 %v632_v16, %v538_v21  ;;  %v728_v31 = vmul.f32 %v4036_v19, %v716_v26 }
 0x1e5   : > { %v729_v34 = vadd.f32 %v727_v25, %v633_v24 }
 0x1e6   : > { %v730_v35 = vadd.f32 %v728_v31, %v634_v30  ;;  %v810_v36 = vpop.f32.mrb[4].mxu1 }
 0x1e7   : > { %v823_v37 = vmul.f32 %v4039_v27, %v810_v36  ;;  %v812_v39 = vpop.f32.mrb[5].mxu1 }
 0x1e8   : > { %v824_v42 = vmul.f32 %v4042_v32, %v812_v39 }
 0x1e9   : > { %v825_v45 = vadd.f32 %v823_v37, %v729_v34 }
 0x1ea   : > { %v826_v46 = vadd.f32 %v824_v42, %v730_v35  ;;  %v906_v48 = vpop.f32.mrb[6].mxu0 }
 0x1eb   : > { %v919_v52 = vmul.f32 %v4045_v40, %v906_v48  ;;  %v908_v53 = vpop.f32.mrb[7].mxu0 }
 0x1ec   : > { %v920_v56 = vmul.f32 %v4048_v44, %v908_v53 }
 0x1ed   : > { %v921_v60 = vadd.f32 %v919_v52, %v825_v45 }
 0x1ee   : > { %v922_v61 = vadd.f32 %v920_v56, %v826_v46  ;;  %v1002_v4 = vpop.f32.mrb[6].mxu1 }
 0x1ef   : > { %v1015_v47 = vmul.f32 %v4051_v55, %v1002_v4  ;;  %v1004_v5 = vpop.f32.mrb[7].mxu1 }
 0x1f0   : > { %v1016_v6 = vmul.f32 %v4054_v57, %v1004_v5 }
 0x1f1   : > { %v1017_v8 = vadd.f32 %v1015_v47, %v921_v60 }
 0x1f2   : > { %v1018_v11 = vadd.f32 %v1016_v6, %v922_v61  ;;  %v1098_v49 = vpop.f32.mrb[8].mxu0 }
 0x1f3   : > { %v1111_v12 = vmul.f32 %v4058_v7, %v1098_v49  ;;  %v1100_v14 = vpop.f32.mrb[9].mxu0 }
 0x1f4   : > { %v1112_v50 = vmul.f32 %v4060_v9, %v1100_v14 }
 0x1f5   : > { %v1113_v15 = vadd.f32 %v1111_v12, %v1017_v8 }
 0x1f6   : > { %v1114_v16 = vadd.f32 %v1112_v50, %v1018_v11 }
 0x1f7   : > { %v1117_v20 = vmul.f32 0.70710677, %v1113_v15 }
 0x1f8   : > { %v1118_v21 = vmul.f32 0.70710677, %v1114_v16 }
 0x1f9   : > { %v1119_v22 = vand.u32 2147483647, %v1117_v20  ;;  %vm1159_vm9 = vcmp.lt.f32.partialorder %v1117_v20, 0.0 }
 0x1fa   : > { %v1120_v24 = vand.u32 2147483647, %v1118_v21  ;;  %vm1160_vm10 = vcmp.lt.f32.partialorder %v1118_v21, 0.0 }
 0x1fb   : > { %v1121_v25 = vmul.f32 0.3275911, %v1119_v22  ;;  %v1147_v31 = vsub.f32 0.0, %v1119_v22 }
 0x1fc   : > { %v1122_v26 = vmul.f32 0.3275911, %v1120_v24  ;;  %v1148_v34 = vsub.f32 0.0, %v1120_v24 }
 0x1fd   : > { %v1123_v29 = vadd.f32 1.0, %v1121_v25  ;;  %v1149_v36 = vmul.f32 %v1147_v31, %v1119_v22 }
 0x1fe   : > { %v1124_v30 = vadd.f32 1.0, %v1122_v26  ;;  %v1150_v41 = vmul.f32 %v1148_v34, %v1120_v24 }
 0x1ff   : > { %3409 = vrcp.f32 %v1123_v29  ;;  %v1151_v46 = vmul.f32 1.442695, %v1149_v36 }
 0x200   : > { %3411 = vrcp.f32 %v1124_v30  ;;  %v1153_v53 = vmul.f32 1.442695, %v1150_v41 }
 0x201   : > { %3413 = vpow2.f32 %v1151_v46  ;;  %v1115_v46 = vmul.f32 0.5, %v1113_v15 }
 0x202   : > { %3415 = vpow2.f32 %v1153_v53 }
 0x209   : > { %v3410_v35 = vpop.eup %3409 }
 0x20a   : > { %v3412_v37 = vpop.eup %3411  ;;  %v1129_v39 = vmul.f32 1.0614054, %v3410_v35 }
 0x20b   : > { %v1130_v42 = vmul.f32 1.0614054, %v3412_v37  ;;  %v3414_v50 = vpop.eup %3413 }
 0x20c   : > { %v1131_v45 = vadd.f32 -1.4531521, %v1129_v39  ;;  %v3416_v24 = vpop.eup %3415 }
 0x20d   : > { %v1132_v48 = vadd.f32 -1.4531521, %v1130_v42  ;;  %v1116_v42 = vmul.f32 0.5, %v1114_v16 }
 0x20e   : > { %v1133_v52 = vmul.f32 %v3410_v35, %v1131_v45 }
 0x20f   : > { %v1134_v56 = vmul.f32 %v3412_v37, %v1132_v48 }
 0x210   : > { %v1135_v60 = vadd.f32 1.4214138, %v1133_v52 }
 0x211   : > { %v1136_v61 = vadd.f32 1.4214138, %v1134_v56 }
 0x212   : > { %v1137_v4 = vmul.f32 %v3410_v35, %v1135_v60 }
 0x213   : > { %v1138_v47 = vmul.f32 %v3412_v37, %v1136_v61 }
 0x214   : > { %v1139_v5 = vadd.f32 -0.28449672, %v1137_v4 }
 0x215   : > { %v1140_v6 = vadd.f32 -0.28449672, %v1138_v47 }
 0x216   : > { %v1141_v8 = vmul.f32 %v3410_v35, %v1139_v5 }
 0x217   : > { %v1142_v11 = vmul.f32 %v3412_v37, %v1140_v6 }
 0x218   : > { %v1143_v49 = vadd.f32 0.2548296, %v1141_v8 }
 0x219   : > { %v1144_v12 = vadd.f32 0.2548296, %v1142_v11 }
 0x21a   : > { %v1145_v14 = vmul.f32 %v3410_v35, %v1143_v49  ;;  %v4064_v35 = vld [vmem:[#allocation8] sm:$0xff] }
 0x21b   : > { %v1146_v22 = vmul.f32 %v3412_v37, %v1144_v12 }
 0x21c   : > { %v1155_v25 = vmul.f32 %v3414_v50, %v1145_v14 }
 0x21d   : > { %v1156_v26 = vmul.f32 %v3416_v24, %v1146_v22 }
 0x21e   : > { %v1157_v29 = vsub.f32 1.0, %v1155_v25 }
 0x21f   : > { %v1158_v30 = vsub.f32 1.0, %v1156_v26 }
 0x220   : > { %v1161_v31 = vsub.f32 0.0, %v1157_v29 }
 0x221   : > { %v1162_v34 = vsub.f32 0.0, %v1158_v30 }
 0x222   : > { %v1163_v36 = vsel %vm1159_vm9, %v1161_v31, %v1157_v29 }
 0x223   : > { %v1165_v39 = vadd.f32 1.0, %v1163_v36  ;;  %v1164_v41 = vsel %vm1160_vm10, %v1162_v34, %v1158_v30 }
 0x224   : > { %v1166_v45 = vadd.f32 1.0, %v1164_v41 }
 0x225   : > { %v1167_v52 = vmul.f32 %v1165_v39, %v1115_v46 }
 0x226   : > { %v1168_v48 = vmul.f32 %v1166_v45, %v1116_v42 }
 0x228   : > { %1172 = vmatprep.subr.mxu1 %v1168_v48 }
 0x229   : > { %1173 = vmatpush1.msra.mxu1 %v1167_v52 }
 0x22a   : > { %3291 = vmatmul.mubr.msk.f32.vlgmr.msra.gmra.mrb[8].mxu1 %vm284_vm0, %v4064_v35 }
 0x22b   : > { %1447 = vmatprep.mubr.f32.mxu1 %v3670_v0 }
 0x2fd   : > { %v1238_v20 = vpop.f32.mrb[8].mxu1 }
 0x2fe   : > { %v1245_v37 = vmul.f32 0.70710677, %v1238_v20  ;;  %v1240_v53 = vpop.f32.mrb[9].mxu1 }
 0x2ff   : > { %v1246_v21 = vmul.f32 0.70710677, %v1240_v53 }
 0x300   : > { %v1247_v56 = vand.u32 2147483647, %v1245_v37  ;;  %vm1287_vm11 = vcmp.lt.f32.partialorder %v1245_v37, 0.0 }
 0x301   : > { %v1248_v60 = vand.u32 2147483647, %v1246_v21  ;;  %vm1288_vm12 = vcmp.lt.f32.partialorder %v1246_v21, 0.0 }
 0x302   : > { %v1249_v16 = vmul.f32 0.3275911, %v1247_v56  ;;  %v1275_v47 = vsub.f32 0.0, %v1247_v56 }
 0x303   : > { %v1250_v61 = vmul.f32 0.3275911, %v1248_v60  ;;  %v1276_v5 = vsub.f32 0.0, %v1248_v60 }
 0x304   : > { %v1251_v15 = vadd.f32 1.0, %v1249_v16  ;;  %v1277_v8 = vmul.f32 %v1275_v47, %v1247_v56 }
 0x305   : > { %v1252_v4 = vadd.f32 1.0, %v1250_v61  ;;  %v1278_v12 = vmul.f32 %v1276_v5, %v1248_v60 }
 0x306   : > { %3417 = vrcp.f32 %v1251_v15  ;;  %v1279_v22 = vmul.f32 1.442695, %v1277_v8 }
 0x307   : > { %3419 = vrcp.f32 %v1252_v4  ;;  %v1281_v26 = vmul.f32 1.442695, %v1278_v12  ;;  %v1243_v12 = vmul.f32 0.5, %v1238_v20 }
 0x308   : > { %3421 = vpow2.f32 %v1279_v22  ;;  %v1244_v22 = vmul.f32 0.5, %v1240_v53 }
 0x309   : > { %3423 = vpow2.f32 %v1281_v26 }
 0x310   : > { %v3418_v6 = vpop.eup %3417 }
 0x311   : > { %v3420_v11 = vpop.eup %3419  ;;  %v1257_v49 = vmul.f32 1.0614054, %v3418_v6 }
 0x312   : > { %v1258_v14 = vmul.f32 1.0614054, %v3420_v11  ;;  %v3422_v56 = vpop.eup %3421 }
 0x313   : > { %v1259_v50 = vadd.f32 -1.4531521, %v1257_v49  ;;  %v3424_v16 = vpop.eup %3423 }
 0x314   : > { %v1260_v24 = vadd.f32 -1.4531521, %v1258_v14 }
 0x315   : > { %v1261_v25 = vmul.f32 %v3418_v6, %v1259_v50 }
 0x316   : > { %v1262_v29 = vmul.f32 %v3420_v11, %v1260_v24 }
 0x317   : > { %v1263_v30 = vadd.f32 1.4214138, %v1261_v25 }
 0x318   : > { %v1264_v31 = vadd.f32 1.4214138, %v1262_v29 }
 0x319   : > { %v1265_v34 = vmul.f32 %v3418_v6, %v1263_v30 }
 0x31a   : > { %v1266_v36 = vmul.f32 %v3420_v11, %v1264_v31 }
 0x31b   : > { %v1267_v39 = vadd.f32 -0.28449672, %v1265_v34 }
 0x31c   : > { %v1268_v41 = vadd.f32 -0.28449672, %v1266_v36 }
 0x31d   : > { %v1269_v42 = vmul.f32 %v3418_v6, %v1267_v39 }
 0x31e   : > { %v1270_v45 = vmul.f32 %v3420_v11, %v1268_v41 }
 0x31f   : > { %v1271_v46 = vadd.f32 0.2548296, %v1269_v42 }
 0x320   : > { %v1272_v48 = vadd.f32 0.2548296, %v1270_v45 }
 0x321   : > { %v1273_v52 = vmul.f32 %v3418_v6, %v1271_v46 }
 0x322   : > { %v1274_v60 = vmul.f32 %v3420_v11, %v1272_v48 }
 0x323   : > { %v1283_v61 = vmul.f32 %v3422_v56, %v1273_v52 }
 0x324   : > { %v1284_v15 = vmul.f32 %v3424_v16, %v1274_v60 }
 0x325   : > { %v1285_v4 = vsub.f32 1.0, %v1283_v61 }
 0x326   : > { %v1286_v47 = vsub.f32 1.0, %v1284_v15 }
 0x327   : > { %v1289_v5 = vsub.f32 0.0, %v1285_v4 }
 0x328   : > { %v1290_v8 = vsub.f32 0.0, %v1286_v47 }
 0x329   : > { %v1291_v49 = vsel %vm1287_vm11, %v1289_v5, %v1285_v4 }
 0x32a   : > { %v1293_v14 = vadd.f32 1.0, %v1291_v49  ;;  %v1292_v50 = vsel %vm1288_vm12, %v1290_v8, %v1286_v47 }
 0x32b   : > { %v1294_v24 = vadd.f32 1.0, %v1292_v50 }
 0x32c   : > { %v1295_v25 = vmul.f32 %v1293_v14, %v1243_v12 }
 0x32d   : > { %v1296_v26 = vmul.f32 %v1294_v24, %v1244_v22 }
 0x32e   : > { %v4070_v6 = vadd.f32 %v1295_v25, %v3925_v3 }
 0x32f   : > { %v4073_v11 = vadd.f32 %v1296_v26, %v3917_v1 }
 0x330   : > { %1706 = vrot.lane.b32.xlu0 %v4070_v6, %s3675_s8  ;;  %1304 = vrot.lane.b32.xlu1 %v4070_v6, %s3672_s23 }
 0x331   : > { %1383 = vmatprep.subr.mxu1 %v4073_v11 }
 0x332   : > { %1384 = vmatpush1.msra.mxu1 %v4070_v6 }
 0x333   : > { %3293 = vmatmul.mubr.msk.f32.vlgmr.msra.gmra.mrb[10].mxu1 %vm284_vm0, %v3923_v2 }
 0x334   : > { %1790 = vrot.lane.b32.xlu0 %v4070_v6, %s3676_s10  ;;  %1457 = vrot.lane.b32.xlu1 %v4070_v6, %s3671_s21 }
 0x335   : > { %1611 = vmatprep.mubr.f32.mxu1 %v3670_v0 }
 0x338   : > { %1541 = vrot.lane.b32.xlu1 %v4070_v6, %s3673_s28  ;;  %1300 = vrot.lane.b32.xlu0 %v4073_v11, %s3672_s23 }
 0x33c   : > { %1625 = vrot.lane.b32.xlu1 %v4070_v6, %s3674_s9  ;;  %1454 = vrot.lane.b32.xlu0 %v4073_v11, %s3671_s21 }
 0x340   : > { %1708 = vrot.lane.b32.xlu1 %v4073_v11, %s3675_s8  ;;  %1538 = vrot.lane.b32.xlu0 %v4073_v11, %s3673_s28 }
 0x344   : > { %1792 = vrot.lane.b32.xlu1 %v4073_v11, %s3676_s10  ;;  %1622 = vrot.lane.b32.xlu0 %v4073_v11, %s3674_s9 }
 0x348   : > { %1876 = vrot.lane.b32.xlu1 %v4073_v11, %s3677_s13  ;;  %1874 = vrot.lane.b32.xlu0 %v4070_v6, %s3677_s13 }
 0x34c   : > { %1960 = vrot.lane.b32.xlu1 %v4073_v11, %s3678_s24  ;;  %1958 = vrot.lane.b32.xlu0 %v4070_v6, %s3678_s24 }
 0x3a2   : > { %v1707_v1 = vpop.permute.xlu0 %1706  ;;  %v1305_v2 = vpop.permute.xlu1 %1304 }
 0x3a6   : > { %v1791_v3 = vpop.permute.xlu0 %1790  ;;  %v1458_v20 = vpop.permute.xlu1 %1457 }
 0x3aa   : > { %v1542_v37 = vpop.permute.xlu1 %1541  ;;  %v1301_v53 = vpop.permute.xlu0 %1300 }
 0x3ab   : > { %v1309_v21 = vsel %vm279_vm1, %v1301_v53, %v1305_v2  ;;  %v1306_v29 = vsel %vm279_vm1, %v1305_v2, %v1301_v53 }
 0x3ac   : > { %1310 = vmatprep.subr.mxu0 %v1306_v29 }
 0x3ad   : > { %1311 = vmatpush1.msra.mxu0 %v1309_v21 }
 0x3ae   : > { %v1626_v30 = vpop.permute.xlu1 %1625  ;;  %v1455_v31 = vpop.permute.xlu0 %1454  ;;  %3292 = vmatmul.mubr.msk.f32.vlgmr.msra.gmra.mrb[10].mxu0 %vm284_vm0, %v3962_v10 }
 0x3af   : > { %v1462_v34 = vsel %vm448_vm2, %v1455_v31, %v1458_v20  ;;  %v1459_v36 = vsel %vm448_vm2, %v1458_v20, %v1455_v31  ;;  %1527 = vmatprep.mubr.f32.mxu0 %v3670_v0 }
 0x3b0   : > { %1463 = vmatprep.subr.mxu0 %v1459_v36 }
 0x3b1   : > { %1464 = vmatpush1.msra.mxu0 %v1462_v34 }
 0x3b2   : > { %v1709_v39 = vpop.permute.xlu1 %1708  ;;  %v1539_v41 = vpop.permute.xlu0 %1538  ;;  %3294 = vmatmul.mubr.msk.f32.vlgmr.msra.gmra.mrb[12].mxu0 %vm284_vm0, %v3971_v17 }
 0x3b3   : > { %v1546_v42 = vsel %vm544_vm3, %v1539_v41, %v1542_v37  ;;  %v1543_v45 = vsel %vm544_vm3, %v1542_v37, %v1539_v41  ;;  %1695 = vmatprep.mubr.f32.mxu0 %v3670_v0  ;;  %v1714_v10 = vsel %vm735_vm5, %v1709_v39, %v1707_v1  ;;  %v1710_v46 = vsel %vm735_vm5, %v1707_v1, %v1709_v39 }
 0x3b4   : > { %1547 = vmatprep.subr.mxu1 %v1543_v45 }
 0x3b5   : > { %1548 = vmatpush1.msra.mxu1 %v1546_v42 }
 0x3b6   : > { %v1793_v48 = vpop.permute.xlu1 %1792  ;;  %v1623_v52 = vpop.permute.xlu0 %1622  ;;  %3295 = vmatmul.mubr.msk.f32.vlgmr.msra.gmra.mrb[12].mxu1 %vm284_vm0, %v3973_v18  ;;  %1715 = vmatprep.subr.mxu1 %v1714_v10 }
 0x3b7   : > { %v1630_v17 = vsel %vm640_vm4, %v1623_v52, %v1626_v30  ;;  %1716 = vmatpush1.msra.mxu1 %v1710_v46  ;;  %v1627_v56 = vsel %vm640_vm4, %v1626_v30, %v1623_v52  ;;  %1779 = vmatprep.mubr.f32.mxu1 %v3670_v0  ;;  %v1798_v60 = vsel %vm831_vm6, %v1793_v48, %v1791_v3 }
 0x3b8   : > { %1631 = vmatprep.subr.mxu0 %v1627_v56  ;;  %v1794_v16 = vsel %vm831_vm6, %v1791_v3, %v1793_v48 }
 0x3b9   : > { %1632 = vmatpush1.msra.mxu0 %v1630_v17 }
 0x3ba   : > { %v1877_v61 = vpop.permute.xlu1 %1876  ;;  %3296 = vmatmul.mubr.msk.f32.vlgmr.msra.gmra.mrb[14].mxu0 %vm284_vm0, %v3982_v23  ;;  %1799 = vmatprep.subr.mxu0 %v1798_v60  ;;  %v1875_v18 = vpop.permute.xlu0 %1874 }
 0x3bb   : > { %v1878_v15 = vsel %vm927_vm7, %v1875_v18, %v1877_v61  ;;  %3297 = vmatmul.mubr.msk.f32.vlgmr.msra.gmra.mrb[14].mxu1 %vm284_vm0, %v3989_v28  ;;  %1800 = vmatpush1.msra.mxu0 %v1794_v16  ;;  %v1882_v4 = vsel %vm927_vm7, %v1877_v61, %v1875_v18 }
 0x3bc   : > { %1883 = vmatprep.subr.mxu1 %v1882_v4  ;;  %1863 = vmatprep.mubr.f32.mxu0 %v3670_v0 }
 0x3bd   : > { %1884 = vmatpush1.msra.mxu1 %v1878_v15  ;;  %1947 = vmatprep.mubr.f32.mxu1 %v3670_v0 }
 0x3be   : > { %v1961_v47 = vpop.permute.xlu1 %1960  ;;  %3298 = vmatmul.mubr.msk.f32.vlgmr.msra.gmra.mrb[16].mxu0 %vm284_vm0, %v3996_v33  ;;  %v1959_v23 = vpop.permute.xlu0 %1958 }
 0x3bf   : > { %v1962_v5 = vsel %vm1023_vm8, %v1959_v23, %v1961_v47  ;;  %3299 = vmatmul.mubr.msk.f32.vlgmr.msra.gmra.mrb[16].mxu1 %vm284_vm0, %v4003_v38  ;;  %v1966_v28 = vsel %vm1023_vm8, %v1961_v47, %v1959_v23  ;;  %2031 = vmatprep.mubr.f32.mxu0 %v3670_v0 }
 0x3c0   : > { %1967 = vmatprep.subr.mxu0 %v1966_v28  ;;  %2160 = vmatprep.mubr.f32.mxu1 %v3670_v0 }
 0x3c1   : > { %1968 = vmatpush1.msra.mxu0 %v1962_v5 }
 0x3c2   : > { %3300 = vmatmul.mubr.msk.f32.vlgmr.msra.gmra.mrb[18].mxu0 %vm284_vm0, %v4010_v43 }
 0x3c3   : > { %2298 = vmatprep.mubr.f32.mxu0 %v3670_v0 }
 0x406   : > { %v1449_v33 = vpop.f32.mrb[10].mxu1 }
 0x407   : > { %v1451_v8 = vpop.f32.mrb[11].mxu1 }
 0x481   : > { %v1376_v49 = vpop.f32.mrb[10].mxu0 }
 0x482   : > { %v1381_v12 = vmul.f32 %v1376_v49, %v4016_v51  ;;  %v1378_v14 = vpop.f32.mrb[11].mxu0 }
 0x483   : > { %v1382_v38 = vmul.f32 %v1378_v14, %v4018_v54 }
 0x484   : > { %v1450_v50 = vadd.f32 %v1449_v33, %v1381_v12 }
 0x485   : > { %v1529_v22 = vpop.f32.mrb[12].mxu0  ;;  %v1452_v24 = vadd.f32 %v1451_v8, %v1382_v38 }
 0x486   : > { %v1534_v25 = vmul.f32 %v1529_v22, %v4021_v58  ;;  %v1531_v26 = vpop.f32.mrb[13].mxu0 }
 0x487   : > { %v1535_v1 = vmul.f32 %v1531_v26, %v4026_v62 }
 0x488   : > { %v1536_v2 = vadd.f32 %v1534_v25, %v1450_v50 }
 0x489   : > { %v1537_v43 = vadd.f32 %v1535_v1, %v1452_v24  ;;  %v1613_v3 = vpop.f32.mrb[12].mxu1 }
 0x48a   : > { %v1618_v20 = vmul.f32 %v1613_v3, %v4023_v59  ;;  %v1615_v37 = vpop.f32.mrb[13].mxu1 }
 0x48b   : > { %v1619_v53 = vmul.f32 %v1615_v37, %v4028_v63 }
 0x48c   : > { %v1620_v21 = vadd.f32 %v1618_v20, %v1536_v2 }
 0x48d   : > { %v1621_v29 = vadd.f32 %v1619_v53, %v1537_v43  ;;  %v1697_v30 = vpop.f32.mrb[14].mxu0 }
 0x48e   : > { %v1702_v31 = vmul.f32 %v1697_v30, %v4032_v13  ;;  %v1699_v34 = vpop.f32.mrb[15].mxu0  ;;  %v1781_v36 = vpop.f32.mrb[14].mxu1 }
 0x48f   : > { %v1703_v39 = vmul.f32 %v1699_v34, %v4036_v19  ;;  %v1786_v41 = vmul.f32 %v1781_v36, %v4039_v27  ;;  %v1783_v42 = vpop.f32.mrb[15].mxu1 }
 0x490   : > { %v1704_v45 = vadd.f32 %v1702_v31, %v1620_v21  ;;  %v1787_v10 = vmul.f32 %v1783_v42, %v4042_v32 }
 0x491   : > { %v1705_v46 = vadd.f32 %v1703_v39, %v1621_v29  ;;  %v1865_v48 = vpop.f32.mrb[16].mxu0 }
 0x492   : > { %v1788_v52 = vadd.f32 %v1786_v41, %v1704_v45  ;;  %v1870_v17 = vmul.f32 %v1865_v48, %v4045_v40  ;;  %v1867_v56 = vpop.f32.mrb[17].mxu0  ;;  %v1949_v60 = vpop.f32.mrb[16].mxu1 }
 0x493   : > { %v1789_v16 = vadd.f32 %v1787_v10, %v1705_v46  ;;  %v1871_v61 = vmul.f32 %v1867_v56, %v4048_v44  ;;  %v1954_v18 = vmul.f32 %v1949_v60, %v4051_v55  ;;  %v1951_v15 = vpop.f32.mrb[17].mxu1 }
 0x494   : > { %v1872_v4 = vadd.f32 %v1870_v17, %v1788_v52  ;;  %v1955_v47 = vmul.f32 %v1951_v15, %v4054_v57 }
 0x495   : > { %v1873_v23 = vadd.f32 %v1871_v61, %v1789_v16  ;;  %v2033_v5 = vpop.f32.mrb[18].mxu0 }
 0x496   : > { %v1956_v28 = vadd.f32 %v1954_v18, %v1872_v4  ;;  %v2038_v33 = vmul.f32 %v4058_v7, %v2033_v5  ;;  %v2035_v8 = vpop.f32.mrb[19].mxu0 }
 0x497   : > { %v1957_v49 = vadd.f32 %v1955_v47, %v1873_v23  ;;  %v2039_v12 = vmul.f32 %v4060_v9, %v2035_v8 }
 0x498   : > { %v2040_v14 = vadd.f32 %v2038_v33, %v1956_v28 }
 0x499   : > { %v2041_v38 = vadd.f32 %v2039_v12, %v1957_v49 }
 0x49a   : > { %v2044_v50 = vmul.f32 0.70710677, %v2040_v14 }
 0x49b   : > { %v2045_v22 = vmul.f32 0.70710677, %v2041_v38 }
 0x49c   : > { %v2046_v24 = vand.u32 2147483647, %v2044_v50  ;;  %vm2086_vm13 = vcmp.lt.f32.partialorder %v2044_v50, 0.0 }
 0x49d   : > { %v2047_v25 = vand.u32 2147483647, %v2045_v22  ;;  %vm2087_vm14 = vcmp.lt.f32.partialorder %v2045_v22, 0.0 }
 0x49e   : > { %v2048_v26 = vmul.f32 0.3275911, %v2046_v24  ;;  %v2074_v3 = vsub.f32 0.0, %v2046_v24 }
 0x49f   : > { %v2049_v1 = vmul.f32 0.3275911, %v2047_v25  ;;  %v2075_v20 = vsub.f32 0.0, %v2047_v25 }
 0x4a0   : > { %v2050_v2 = vadd.f32 1.0, %v2048_v26  ;;  %v2076_v7 = vmul.f32 %v2074_v3, %v2046_v24 }
 0x4a1   : > { %v2051_v43 = vadd.f32 1.0, %v2049_v1  ;;  %v2077_v29 = vmul.f32 %v2075_v20, %v2047_v25  ;;  %v2043_v25 = vmul.f32 0.5, %v2041_v38  ;;  %v2042_v1 = vmul.f32 0.5, %v2040_v14 }
 0x4a2   : > { %3425 = vrcp.f32 %v2050_v2  ;;  %v2078_v31 = vmul.f32 1.442695, %v2076_v7 }
 0x4a3   : > { %3427 = vrcp.f32 %v2051_v43  ;;  %v2080_v39 = vmul.f32 1.442695, %v2077_v29 }
 0x4a4   : > { %3429 = vpow2.f32 %v2078_v31 }
 0x4a5   : > { %3431 = vpow2.f32 %v2080_v39 }
 0x4ac   : > { %v3426_v37 = vpop.eup %3425 }
 0x4ad   : > { %v3428_v53 = vpop.eup %3427  ;;  %v2056_v21 = vmul.f32 1.0614054, %v3426_v37 }
 0x4ae   : > { %v2057_v9 = vmul.f32 1.0614054, %v3428_v53  ;;  %v3430_v18 = vpop.eup %3429 }
 0x4af   : > { %v2058_v30 = vadd.f32 -1.4531521, %v2056_v21  ;;  %v3432_v4 = vpop.eup %3431 }
 0x4b0   : > { %v2059_v34 = vadd.f32 -1.4531521, %v2057_v9 }
 0x4b1   : > { %v2060_v36 = vmul.f32 %v3426_v37, %v2058_v30 }
 0x4b2   : > { %v2061_v41 = vmul.f32 %v3428_v53, %v2059_v34 }
 0x4b3   : > { %v2062_v42 = vadd.f32 1.4214138, %v2060_v36 }
 0x4b4   : > { %v2063_v45 = vadd.f32 1.4214138, %v2061_v41 }
 0x4b5   : > { %v2064_v10 = vmul.f32 %v3426_v37, %v2062_v42 }
 0x4b6   : > { %v2065_v46 = vmul.f32 %v3428_v53, %v2063_v45 }
 0x4b7   : > { %v2066_v48 = vadd.f32 -0.28449672, %v2064_v10 }
 0x4b8   : > { %v2067_v52 = vadd.f32 -0.28449672, %v2065_v46 }
 0x4b9   : > { %v2068_v17 = vmul.f32 %v3426_v37, %v2066_v48 }
 0x4ba   : > { %v2069_v56 = vmul.f32 %v3428_v53, %v2067_v52 }
 0x4bb   : > { %v2070_v60 = vadd.f32 0.2548296, %v2068_v17 }
 0x4bc   : > { %v2071_v16 = vadd.f32 0.2548296, %v2069_v56 }
 0x4bd   : > { %v2072_v61 = vmul.f32 %v3426_v37, %v2070_v60 }
 0x4be   : > { %v2073_v15 = vmul.f32 %v3428_v53, %v2071_v16 }
 0x4bf   : > { %v2082_v47 = vmul.f32 %v3430_v18, %v2072_v61 }
 0x4c0   : > { %v2083_v23 = vmul.f32 %v3432_v4, %v2073_v15 }
 0x4c1   : > { %v2084_v5 = vsub.f32 1.0, %v2082_v47 }
 0x4c2   : > { %v2085_v28 = vsub.f32 1.0, %v2083_v23 }
 0x4c3   : > { %v2088_v33 = vsub.f32 0.0, %v2084_v5 }
 0x4c4   : > { %v2089_v8 = vsub.f32 0.0, %v2085_v28 }
 0x4c5   : > { %v2090_v49 = vsel %vm2086_vm13, %v2088_v33, %v2084_v5 }
 0x4c6   : > { %v2092_v12 = vadd.f32 1.0, %v2090_v49  ;;  %v2091_v24 = vsel %vm2087_vm14, %v2089_v8, %v2085_v28 }
 0x4c7   : > { %v2093_v26 = vadd.f32 1.0, %v2091_v24 }
 0x4c8   : > { %v2094_v43 = vmul.f32 %v2092_v12, %v2042_v1 }
 0x4c9   : > { %v2095_v2 = vmul.f32 %v2093_v26, %v2043_v25 }
 0x4cb   : > { %2096 = vmatprep.subr.mxu1 %v2095_v2 }
 0x4cc   : > { %2097 = vmatpush1.msra.mxu1 %v2094_v43 }
 0x4cd   : > { %3301 = vmatmul.mubr.msk.f32.vlgmr.msra.gmra.mrb[18].mxu1 %vm284_vm0, %v4064_v35 }
 0x4ce   : > { %2371 = vmatprep.mubr.f32.mxu1 %v3670_v0 }
 0x5a0   : > { %v2162_v3 = vpop.f32.mrb[18].mxu1 }
 0x5a1   : > { %v2169_v20 = vmul.f32 0.70710677, %v2162_v3  ;;  %v2164_v50 = vpop.f32.mrb[19].mxu1  ;;  %v2167_v43 = vmul.f32 0.5, %v2162_v3  ;;  %v3457_v3 = vld [vmem:[#allocation7 + $0x20] sm:$0xff] }
 0x5a2   : > { %v2170_v37 = vmul.f32 0.70710677, %v2164_v50 }
 0x5a3   : > { %v2171_v7 = vand.u32 2147483647, %v2169_v20  ;;  %vm2211_vm15 = vcmp.lt.f32.partialorder %v2169_v20, 0.0 }
 0x5a4   : > { %v2172_v22 = vand.u32 2147483647, %v2170_v37  ;;  %vm2212_vm9 = vcmp.lt.f32.partialorder %v2170_v37, 0.0 }
 0x5a5   : > { %v2173_v53 = vmul.f32 0.3275911, %v2171_v7  ;;  %v2199_v14 = vsub.f32 0.0, %v2171_v7 }
 0x5a6   : > { %v2174_v21 = vmul.f32 0.3275911, %v2172_v22  ;;  %v2200_v9 = vsub.f32 0.0, %v2172_v22 }
 0x5a7   : > { %v2175_v38 = vadd.f32 1.0, %v2173_v53  ;;  %v2201_v31 = vmul.f32 %v2199_v14, %v2171_v7  ;;  %v2168_v53 = vmul.f32 0.5, %v2164_v50 }
 0x5a8   : > { %v2176_v29 = vadd.f32 1.0, %v2174_v21  ;;  %v2202_v39 = vmul.f32 %v2200_v9, %v2172_v22 }
 0x5a9   : > { %3433 = vrcp.f32 %v2175_v38  ;;  %v2203_v45 = vmul.f32 1.442695, %v2201_v31 }
 0x5aa   : > { %3435 = vrcp.f32 %v2176_v29  ;;  %v2205_v48 = vmul.f32 1.442695, %v2202_v39 }
 0x5ab   : > { %3437 = vpow2.f32 %v2203_v45 }
 0x5ac   : > { %3439 = vpow2.f32 %v2205_v48  ;;  %v3459_v48 = vld [vmem:[#allocation7 + $0x8] sm:$0xff] }
 0x5b3   : > { %v3434_v30 = vpop.eup %3433 }
 0x5b4   : > { %v3436_v34 = vpop.eup %3435  ;;  %v2181_v36 = vmul.f32 1.0614054, %v3434_v30 }
 0x5b5   : > { %v2182_v41 = vmul.f32 1.0614054, %v3436_v34  ;;  %v3438_v28 = vpop.eup %3437 }
 0x5b6   : > { %v2183_v42 = vadd.f32 -1.4531521, %v2181_v36  ;;  %v3440_v8 = vpop.eup %3439 }
 0x5b7   : > { %v2184_v10 = vadd.f32 -1.4531521, %v2182_v41  ;;  %v3458_v41 = vld [vmem:[#allocation7] sm:$0xff] }
 0x5b8   : > { %v2185_v46 = vmul.f32 %v3434_v30, %v2183_v42 }
 0x5b9   : > { %v2186_v52 = vmul.f32 %v3436_v34, %v2184_v10 }
 0x5ba   : > { %v2187_v17 = vadd.f32 1.4214138, %v2185_v46 }
 0x5bb   : > { %v2188_v56 = vadd.f32 1.4214138, %v2186_v52 }
 0x5bc   : > { %v2189_v60 = vmul.f32 %v3434_v30, %v2187_v17 }
 0x5bd   : > { %v2190_v16 = vmul.f32 %v3436_v34, %v2188_v56 }
 0x5be   : > { %v2191_v61 = vadd.f32 -0.28449672, %v2189_v60 }
 0x5bf   : > { %v2192_v18 = vadd.f32 -0.28449672, %v2190_v16 }
 0x5c0   : > { %v2193_v15 = vmul.f32 %v3434_v30, %v2191_v61 }
 0x5c1   : > { %v2194_v4 = vmul.f32 %v3436_v34, %v2192_v18  ;;  %v3460_v18 = vld [vmem:[#allocation7 + $0x10] sm:$0xff] }
 0x5c2   : > { %v2195_v47 = vadd.f32 0.2548296, %v2193_v15 }
 0x5c3   : > { %v2196_v23 = vadd.f32 0.2548296, %v2194_v4 }
 0x5c4   : > { %v2197_v5 = vmul.f32 %v3434_v30, %v2195_v47 }
 0x5c5   : > { %v2198_v33 = vmul.f32 %v3436_v34, %v2196_v23 }
 0x5c6   : > { %v2207_v49 = vmul.f32 %v3438_v28, %v2197_v5  ;;  %v3461_v28 = vld [vmem:[#allocation7 + $0x18] sm:$0xff] }
 0x5c7   : > { %v2208_v12 = vmul.f32 %v3440_v8, %v2198_v33 }
 0x5c8   : > { %v2209_v24 = vsub.f32 1.0, %v2207_v49  ;;  %v3462_v49 = vld [vmem:[#allocation7 + $0x28] sm:$0xff] }
 0x5c9   : > { %v2210_v25 = vsub.f32 1.0, %v2208_v12 }
 0x5ca   : > { %v2213_v26 = vsub.f32 0.0, %v2209_v24 }
 0x5cb   : > { %v2214_v1 = vsub.f32 0.0, %v2210_v25 }
 0x5cc   : > { %v2215_v2 = vsel %vm2211_vm15, %v2213_v26, %v2209_v24 }
 0x5cd   : > { %v2217_v7 = vadd.f32 1.0, %v2215_v2  ;;  %v2216_v22 = vsel %vm2212_vm9, %v2214_v1, %v2210_v25  ;;  %v3463_v25 = vld [vmem:[#allocation7 + $0x30] sm:$0xff]  ;;  %v3464_v2 = vld [vmem:[#allocation7 + $0x38] sm:$0xff] }
 0x5ce   : > { %v2218_v21 = vadd.f32 1.0, %v2216_v22 }
 0x5cf   : > { %v2219_v38 = vmul.f32 %v2217_v7, %v2167_v43  ;;  %v3465_v7 = vld [vmem:[#allocation7 + $0x40] sm:$0xff] }
 0x5d0   : > { %v2220_v29 = vmul.f32 %v2218_v21, %v2168_v53 }
 0x5d1   : > { %v4172_v14 = vadd.f32 %v2219_v38, %v4070_v6 }
 0x5d2   : > { %v4175_v9 = vadd.f32 %v2220_v29, %v4073_v11 }
 0x5d3   : > { %2630 = vrot.lane.b32.xlu0 %v4172_v14, %s3675_s8  ;;  %2228 = vrot.lane.b32.xlu1 %v4172_v14, %s3672_s23 }
 0x5d4   : > { %2307 = vmatprep.subr.mxu1 %v4175_v9 }
 0x5d5   : > { %2308 = vmatpush1.msra.mxu1 %v4172_v14 }
 0x5d6   : > { %3303 = vmatmul.mubr.msk.f32.vlgmr.msra.gmra.mrb[20].mxu1 %vm284_vm0, %v3457_v3 }
 0x5d7   : > { %2714 = vrot.lane.b32.xlu0 %v4172_v14, %s3676_s10  ;;  %2381 = vrot.lane.b32.xlu1 %v4172_v14, %s3671_s21 }
 0x5d8   : > { %2535 = vmatprep.mubr.f32.mxu1 %v3670_v0 }
 0x5db   : > { %2465 = vrot.lane.b32.xlu1 %v4172_v14, %s3673_s28  ;;  %2224 = vrot.lane.b32.xlu0 %v4175_v9, %s3672_s23 }
 0x5df   : > { %2549 = vrot.lane.b32.xlu1 %v4172_v14, %s3674_s9  ;;  %2378 = vrot.lane.b32.xlu0 %v4175_v9, %s3671_s21  ;;  %s3586_s21 = sshll.u32 %s3679_s6, 4  ;;  %s3587_s21 = int_to_ptr.vmem [resolvable:$false] %s3586_s21 }
 0x5e0   : > { %s3588_s23 = scalar_lea.vmem %s3587_s21, 512  ;;  %p3589_p1 = scmp.lt.s32.totalorder %s4269_s29, %s3587_s21 }
 0x5e1   : > { %p3590_p4 = scmp.lt.s32.totalorder %s3588_s23, %s3582_s7 }
 0x5e3   : > { %2632 = vrot.lane.b32.xlu1 %v4175_v9, %s3675_s8  ;;  %2462 = vrot.lane.b32.xlu0 %v4175_v9, %s3673_s28  ;;  %p3591_p0 = por %p3590_p4, %p3589_p1 }
 0x5e5   : > { %p3592_p9 = pnand %p3591_p0, %p3585_p2 }
 0x5e7   : > { %2716 = vrot.lane.b32.xlu1 %v4175_v9, %s3676_s10  ;;  %2546 = vrot.lane.b32.xlu0 %v4175_v9, %s3674_s9 }
 0x5eb   : > { %2800 = vrot.lane.b32.xlu1 %v4175_v9, %s3677_s13  ;;  %2798 = vrot.lane.b32.xlu0 %v4172_v14, %s3677_s13 }
 0x5ef   : > { %2884 = vrot.lane.b32.xlu1 %v4175_v9, %s3678_s24  ;;  %2882 = vrot.lane.b32.xlu0 %v4172_v14, %s3678_s24 }
 0x645   : > { %v2631_v6 = vpop.permute.xlu0 %2630  ;;  %v2229_v11 = vpop.permute.xlu1 %2228 }
 0x649   : > { %v2715_v20 = vpop.permute.xlu0 %2714  ;;  %v2382_v50 = vpop.permute.xlu1 %2381 }
 0x64d   : > { %v2466_v37 = vpop.permute.xlu1 %2465  ;;  %v2225_v30 = vpop.permute.xlu0 %2224 }
 0x64e   : > { %v2233_v31 = vsel %vm279_vm1, %v2225_v30, %v2229_v11  ;;  %v2230_v34 = vsel %vm279_vm1, %v2229_v11, %v2225_v30 }
 0x64f   : > { %2234 = vmatprep.subr.mxu0 %v2230_v34 }
 0x650   : > { %2235 = vmatpush1.msra.mxu0 %v2233_v31 }
 0x651   : > { %v2550_v36 = vpop.permute.xlu1 %2549  ;;  %v2379_v39 = vpop.permute.xlu0 %2378  ;;  %3302 = vmatmul.mubr.msk.f32.vlgmr.msra.gmra.mrb[20].mxu0 %vm284_vm0, %v3458_v41 }
 0x652   : > { %v2386_v42 = vsel %vm448_vm2, %v2379_v39, %v2382_v50  ;;  %v2383_v45 = vsel %vm448_vm2, %v2382_v50, %v2379_v39  ;;  %2451 = vmatprep.mubr.f32.mxu0 %v3670_v0 }
 0x653   : > { %2387 = vmatprep.subr.mxu0 %v2383_v45 }
 0x654   : > { %2388 = vmatpush1.msra.mxu0 %v2386_v42 }
 0x655   : > { %v2633_v10 = vpop.permute.xlu1 %2632  ;;  %v2463_v46 = vpop.permute.xlu0 %2462  ;;  %3304 = vmatmul.mubr.msk.f32.vlgmr.msra.gmra.mrb[22].mxu0 %vm284_vm0, %v3459_v48 }
 0x656   : > { %v2470_v52 = vsel %vm544_vm3, %v2463_v46, %v2466_v37  ;;  %v2467_v17 = vsel %vm544_vm3, %v2466_v37, %v2463_v46  ;;  %2619 = vmatprep.mubr.f32.mxu0 %v3670_v0  ;;  %v2638_v56 = vsel %vm735_vm5, %v2633_v10, %v2631_v6  ;;  %v2634_v60 = vsel %vm735_vm5, %v2631_v6, %v2633_v10 }
 0x657   : > { %2471 = vmatprep.subr.mxu1 %v2467_v17 }
 0x658   : > { %2472 = vmatpush1.msra.mxu1 %v2470_v52 }
 0x659   : > { %v2717_v16 = vpop.permute.xlu1 %2716  ;;  %v2547_v61 = vpop.permute.xlu0 %2546  ;;  %3305 = vmatmul.mubr.msk.f32.vlgmr.msra.gmra.mrb[22].mxu1 %vm284_vm0, %v3460_v18  ;;  %2639 = vmatprep.subr.mxu1 %v2638_v56 }
 0x65a   : > { %v2554_v15 = vsel %vm640_vm4, %v2547_v61, %v2550_v36  ;;  %2640 = vmatpush1.msra.mxu1 %v2634_v60  ;;  %v2551_v4 = vsel %vm640_vm4, %v2550_v36, %v2547_v61  ;;  %2703 = vmatprep.mubr.f32.mxu1 %v3670_v0  ;;  %v2722_v47 = vsel %vm831_vm6, %v2717_v16, %v2715_v20 }
 0x65b   : > { %2555 = vmatprep.subr.mxu0 %v2551_v4  ;;  %v2718_v23 = vsel %vm831_vm6, %v2715_v20, %v2717_v16 }
 0x65c   : > { %2556 = vmatpush1.msra.mxu0 %v2554_v15 }
 0x65d   : > { %v2801_v5 = vpop.permute.xlu1 %2800  ;;  %3306 = vmatmul.mubr.msk.f32.vlgmr.msra.gmra.mrb[24].mxu0 %vm284_vm0, %v3461_v28  ;;  %2723 = vmatprep.subr.mxu0 %v2722_v47  ;;  %v2799_v33 = vpop.permute.xlu0 %2798 }
 0x65e   : > { %v2802_v8 = vsel %vm927_vm7, %v2799_v33, %v2801_v5  ;;  %3307 = vmatmul.mubr.msk.f32.vlgmr.msra.gmra.mrb[24].mxu1 %vm284_vm0, %v3462_v49  ;;  %2724 = vmatpush1.msra.mxu0 %v2718_v23  ;;  %v2806_v12 = vsel %vm927_vm7, %v2801_v5, %v2799_v33  ;;  %v3467_v49 = vld [vmem:[#allocation2 + $0x18] ss:$0 sm:$0xff] }
 0x65f   : > { %2807 = vmatprep.subr.mxu1 %v2806_v12  ;;  %2787 = vmatprep.mubr.f32.mxu0 %v3670_v0 }
 0x660   : > { %2808 = vmatpush1.msra.mxu1 %v2802_v8  ;;  %2871 = vmatprep.mubr.f32.mxu1 %v3670_v0 }
 0x661   : > { %v2885_v24 = vpop.permute.xlu1 %2884  ;;  %3308 = vmatmul.mubr.msk.f32.vlgmr.msra.gmra.mrb[26].mxu0 %vm284_vm0, %v3463_v25  ;;  %v2883_v26 = vpop.permute.xlu0 %2882 }
 0x662   : > { %v2886_v1 = vsel %vm1023_vm8, %v2883_v26, %v2885_v24  ;;  %3309 = vmatmul.mubr.msk.f32.vlgmr.msra.gmra.mrb[26].mxu1 %vm284_vm0, %v3464_v2  ;;  %v2890_v43 = vsel %vm1023_vm8, %v2885_v24, %v2883_v26  ;;  %2955 = vmatprep.mubr.f32.mxu0 %v3670_v0 }
 0x663   : > { %2891 = vmatprep.subr.mxu0 %v2890_v43  ;;  %3084 = vmatprep.mubr.f32.mxu1 %v3670_v0 }
 0x664   : > { %2892 = vmatpush1.msra.mxu0 %v2886_v1 }
 0x665   : > { %3310 = vmatmul.mubr.msk.f32.vlgmr.msra.gmra.mrb[28].mxu0 %vm284_vm0, %v3465_v7 }
 0x6a9   : > { %v2373_v22 = vpop.f32.mrb[20].mxu1 }
 0x6aa   : > { %v2375_v53 = vpop.f32.mrb[21].mxu1 }
 0x724   : > { %v2300_v21 = vpop.f32.mrb[20].mxu0 }
 0x725   : > { %v2305_v38 = vmul.f32 %v2300_v21, %v4016_v51  ;;  %v2302_v29 = vpop.f32.mrb[21].mxu0 }
 0x726   : > { %v2306_v3 = vmul.f32 %v2302_v29, %v4018_v54 }
 0x727   : > { %v2374_v6 = vadd.f32 %v2373_v22, %v2305_v38 }
 0x728   : > { %v2453_v11 = vpop.f32.mrb[22].mxu0  ;;  %v2376_v20 = vadd.f32 %v2375_v53, %v2306_v3 }
 0x729   : > { %v2458_v50 = vmul.f32 %v2453_v11, %v4021_v58  ;;  %v2455_v37 = vpop.f32.mrb[23].mxu0 }
 0x72a   : > { %v2459_v0 = vmul.f32 %v2455_v37, %v4026_v62 }
 0x72b   : > { %v2460_v30 = vadd.f32 %v2458_v50, %v2374_v6 }
 0x72c   : > { %v2461_v31 = vadd.f32 %v2459_v0, %v2376_v20  ;;  %v2537_v34 = vpop.f32.mrb[22].mxu1 }
 0x72d   : > { %v2542_v36 = vmul.f32 %v2537_v34, %v4023_v59  ;;  %v2539_v39 = vpop.f32.mrb[23].mxu1 }
 0x72e   : > { %v2543_v41 = vmul.f32 %v2539_v39, %v4028_v63 }
 0x72f   : > { %v2544_v51 = vadd.f32 %v2542_v36, %v2460_v30 }
 0x730   : > { %v2545_v42 = vadd.f32 %v2543_v41, %v2461_v31  ;;  %v2621_v45 = vpop.f32.mrb[24].mxu0 }
 0x731   : > { %v2626_v54 = vmul.f32 %v2621_v45, %v4032_v13  ;;  %v2623_v10 = vpop.f32.mrb[25].mxu0  ;;  %v2705_v46 = vpop.f32.mrb[24].mxu1 }
 0x732   : > { %v2627_v58 = vmul.f32 %v2623_v10, %v4036_v19  ;;  %v2710_v48 = vmul.f32 %v2705_v46, %v4039_v27  ;;  %v2707_v62 = vpop.f32.mrb[25].mxu1 }
 0x733   : > { %v2628_v52 = vadd.f32 %v2626_v54, %v2544_v51  ;;  %v2711_v17 = vmul.f32 %v2707_v62, %v4042_v32  ;;  %v3466_v32 = vld [vmem:[#allocation2 + $0x10] ss:$0 sm:$0xff] }
 0x734   : > { %v2629_v56 = vadd.f32 %v2627_v58, %v2545_v42  ;;  %v2789_v59 = vpop.f32.mrb[26].mxu0 }
 0x735   : > { %v2712_v60 = vadd.f32 %v2710_v48, %v2628_v52  ;;  %v2794_v63 = vmul.f32 %v2789_v59, %v4045_v40  ;;  %v2791_v16 = vpop.f32.mrb[27].mxu0  ;;  %v2873_v61 = vpop.f32.mrb[26].mxu1 }
 0x736   : > { %v2713_v18 = vadd.f32 %v2711_v17, %v2629_v56  ;;  %v2795_v13 = vmul.f32 %v2791_v16, %v4048_v44  ;;  %v2878_v15 = vmul.f32 %v2873_v61, %v4051_v55  ;;  %v2875_v4 = vpop.f32.mrb[27].mxu1 }
 0x737   : > { %v2796_v19 = vadd.f32 %v2794_v63, %v2712_v60  ;;  %v2879_v27 = vmul.f32 %v2875_v4, %v4054_v57 }
 0x738   : > { %v2797_v47 = vadd.f32 %v2795_v13, %v2713_v18  ;;  %v2957_v23 = vpop.f32.mrb[28].mxu0 }
 0x739   : > { %v2880_v5 = vadd.f32 %v2878_v15, %v2796_v19  ;;  %v2962_v28 = vmul.f32 %v3466_v32, %v2957_v23  ;;  %v2959_v33 = vpop.f32.mrb[29].mxu0 }
 0x73a   : > { %v2881_v8 = vadd.f32 %v2879_v27, %v2797_v47  ;;  %v2963_v40 = vmul.f32 %v3467_v49, %v2959_v33 }
 0x73b   : > { %v2964_v12 = vadd.f32 %v2962_v28, %v2880_v5 }
 0x73c   : > { %v2965_v24 = vadd.f32 %v2963_v40, %v2881_v8 }
 0x73d   : > { %v2968_v25 = vmul.f32 0.70710677, %v2964_v12  ;;  %v2966_v4 = vmul.f32 0.5, %v2964_v12 }
 0x73e   : > { %v2969_v26 = vmul.f32 0.70710677, %v2965_v24  ;;  %v2967_v13 = vmul.f32 0.5, %v2965_v24 }
 0x73f   : > { %v2970_v44 = vand.u32 2147483647, %v2968_v25  ;;  %vm3010_vm1 = vcmp.lt.f32.partialorder %v2968_v25, 0.0 }
 0x740   : > { %v2971_v1 = vand.u32 2147483647, %v2969_v26  ;;  %vm3011_vm2 = vcmp.lt.f32.partialorder %v2969_v26, 0.0 }
 0x741   : > { %v2972_v55 = vmul.f32 0.3275911, %v2970_v44  ;;  %v2998_v57 = vsub.f32 0.0, %v2970_v44 }
 0x742   : > { %v2973_v2 = vmul.f32 0.3275911, %v2971_v1  ;;  %v2999_v22 = vsub.f32 0.0, %v2971_v1 }
 0x743   : > { %v2974_v43 = vadd.f32 1.0, %v2972_v55  ;;  %v3000_v21 = vmul.f32 %v2998_v57, %v2970_v44 }
 0x744   : > { %v2975_v7 = vadd.f32 1.0, %v2973_v2  ;;  %v3001_v3 = vmul.f32 %v2999_v22, %v2971_v1 }
 0x745   : > { %3441 = vrcp.f32 %v2974_v43  ;;  %v3002_v20 = vmul.f32 1.442695, %v3000_v21 }
 0x746   : > { %3443 = vrcp.f32 %v2975_v7  ;;  %v3004_v0 = vmul.f32 1.442695, %v3001_v3 }
 0x747   : > { %3445 = vpow2.f32 %v3002_v20 }
 0x748   : > { %3447 = vpow2.f32 %v3004_v0 }
 0x74f   : > { %v3442_v53 = vpop.eup %3441 }
 0x750   : > { %v3444_v38 = vpop.eup %3443  ;;  %v2980_v29 = vmul.f32 1.0614054, %v3442_v53 }
 0x751   : > { %v2981_v6 = vmul.f32 1.0614054, %v3444_v38  ;;  %v3446_v58 = vpop.eup %3445 }
 0x752   : > { %v2982_v11 = vadd.f32 -1.4531521, %v2980_v29  ;;  %v3448_v62 = vpop.eup %3447 }
 0x753   : > { %v2983_v50 = vadd.f32 -1.4531521, %v2981_v6 }
 0x754   : > { %v2984_v37 = vmul.f32 %v3442_v53, %v2982_v11 }
 0x755   : > { %v2985_v30 = vmul.f32 %v3444_v38, %v2983_v50 }
 0x756   : > { %v2986_v31 = vadd.f32 1.4214138, %v2984_v37 }
 0x757   : > { %v2987_v34 = vadd.f32 1.4214138, %v2985_v30 }
 0x758   : > { %v2988_v36 = vmul.f32 %v3442_v53, %v2986_v31 }
 0x759   : > { %v2989_v39 = vmul.f32 %v3444_v38, %v2987_v34 }
 0x75a   : > { %v2990_v41 = vadd.f32 -0.28449672, %v2988_v36 }
 0x75b   : > { %v2991_v51 = vadd.f32 -0.28449672, %v2989_v39 }
 0x75c   : > { %v2992_v42 = vmul.f32 %v3442_v53, %v2990_v41 }
 0x75d   : > { %v2993_v45 = vmul.f32 %v3444_v38, %v2991_v51 }
 0x75e   : > { %v2994_v54 = vadd.f32 0.2548296, %v2992_v42 }
 0x75f   : > { %v2995_v10 = vadd.f32 0.2548296, %v2993_v45 }
 0x760   : > { %v2996_v46 = vmul.f32 %v3442_v53, %v2994_v54 }
 0x761   : > { %v2997_v48 = vmul.f32 %v3444_v38, %v2995_v10 }
 0x762   : > { %v3006_v52 = vmul.f32 %v3446_v58, %v2996_v46 }
 0x763   : > { %v3007_v17 = vmul.f32 %v3448_v62, %v2997_v48 }
 0x764   : > { %v3008_v56 = vsub.f32 1.0, %v3006_v52 }
 0x765   : > { %v3009_v59 = vsub.f32 1.0, %v3007_v17 }
 0x766   : > { %v3012_v60 = vsub.f32 0.0, %v3008_v56 }
 0x767   : > { %v3013_v63 = vsub.f32 0.0, %v3009_v59 }
 0x768   : > { %v3014_v16 = vsel %vm3010_vm1, %v3012_v60, %v3008_v56 }
 0x769   : > { %v3016_v61 = vadd.f32 1.0, %v3014_v16  ;;  %v3015_v18 = vsel %vm3011_vm2, %v3013_v63, %v3009_v59 }
 0x76a   : > { %v3017_v15 = vadd.f32 1.0, %v3015_v18 }
 0x76b   : > { %v3018_v27 = vmul.f32 %v3016_v61, %v2966_v4 }
 0x76c   : > { %v3019_v19 = vmul.f32 %v3017_v15, %v2967_v13 }
 0x76e   : > { %3020 = vmatprep.subr.mxu1 %v3019_v19 }
 0x76f   : > { %3021 = vmatpush1.msra.mxu1 %v3018_v27 }
 0x770   : > { %3311 = vmatmul.mubr.msk.f32.vlgmr.msra.gmra.mrb[28].mxu1 %vm284_vm0, %v4064_v35 }
 0x843   : > { %v3086_v47 = vpop.f32.mrb[28].mxu1 }
 0x844   : > { %v3093_v23 = vmul.f32 0.70710677, %v3086_v47  ;;  %v3088_v5 = vpop.f32.mrb[29].mxu1  ;;  %v3091_v58 = vmul.f32 0.5, %v3086_v47 }
 0x845   : > { %v3094_v32 = vmul.f32 0.70710677, %v3088_v5  ;;  %v3092_v52 = vmul.f32 0.5, %v3088_v5 }
 0x846   : > { %v3095_v28 = vand.u32 2147483647, %v3093_v23  ;;  %vm3135_vm0 = vcmp.lt.f32.partialorder %v3093_v23, 0.0 }
 0x847   : > { %v3096_v33 = vand.u32 2147483647, %v3094_v32  ;;  %vm3136_vm3 = vcmp.lt.f32.partialorder %v3094_v32, 0.0 }
 0x848   : > { %v3097_v8 = vmul.f32 0.3275911, %v3095_v28  ;;  %v3123_v12 = vsub.f32 0.0, %v3095_v28 }
 0x849   : > { %v3098_v49 = vmul.f32 0.3275911, %v3096_v33  ;;  %v3124_v24 = vsub.f32 0.0, %v3096_v33 }
 0x84a   : > { %v3099_v40 = vadd.f32 1.0, %v3097_v8  ;;  %v3125_v44 = vmul.f32 %v3123_v12, %v3095_v28 }
 0x84b   : > { %v3100_v25 = vadd.f32 1.0, %v3098_v49  ;;  %v3126_v2 = vmul.f32 %v3124_v24, %v3096_v33 }
 0x84c   : > { %3449 = vrcp.f32 %v3099_v40  ;;  %v3127_v7 = vmul.f32 1.442695, %v3125_v44 }
 0x84d   : > { %3451 = vrcp.f32 %v3100_v25  ;;  %v3129_v53 = vmul.f32 1.442695, %v3126_v2 }
 0x84e   : > { %3453 = vpow2.f32 %v3127_v7 }
 0x84f   : > { %3455 = vpow2.f32 %v3129_v53 }
 0x856   : > { %v3450_v26 = vpop.eup %3449 }
 0x857   : > { %v3452_v1 = vpop.eup %3451  ;;  %v3105_v55 = vmul.f32 1.0614054, %v3450_v26 }
 0x858   : > { %v3106_v35 = vmul.f32 1.0614054, %v3452_v1  ;;  %v3454_v34 = vpop.eup %3453 }
 0x859   : > { %v3107_v43 = vadd.f32 -1.4531521, %v3105_v55  ;;  %v3456_v39 = vpop.eup %3455 }
 0x85a   : > { %v3108_v57 = vadd.f32 -1.4531521, %v3106_v35 }
 0x85b   : > { %v3109_v22 = vmul.f32 %v3450_v26, %v3107_v43 }
 0x85c   : > { %v3110_v21 = vmul.f32 %v3452_v1, %v3108_v57 }
 0x85d   : > { %v3111_v38 = vadd.f32 1.4214138, %v3109_v22 }
 0x85e   : > { %v3112_v29 = vadd.f32 1.4214138, %v3110_v21 }
 0x85f   : > { %v3113_v3 = vmul.f32 %v3450_v26, %v3111_v38 }
 0x860   : > { %v3114_v6 = vmul.f32 %v3452_v1, %v3112_v29 }
 0x861   : > { %v3115_v11 = vadd.f32 -0.28449672, %v3113_v3 }
 0x862   : > { %v3116_v20 = vadd.f32 -0.28449672, %v3114_v6 }
 0x863   : > { %v3117_v50 = vmul.f32 %v3450_v26, %v3115_v11 }
 0x864   : > { %v3118_v37 = vmul.f32 %v3452_v1, %v3116_v20 }
 0x865   : > { %v3119_v0 = vadd.f32 0.2548296, %v3117_v50 }
 0x866   : > { %v3120_v30 = vadd.f32 0.2548296, %v3118_v37 }
 0x867   : > { %v3121_v31 = vmul.f32 %v3450_v26, %v3119_v0 }
 0x868   : > { %v3122_v36 = vmul.f32 %v3452_v1, %v3120_v30 }
 0x869   : > { %v3131_v41 = vmul.f32 %v3454_v34, %v3121_v31 }
 0x86a   : > { %v3132_v51 = vmul.f32 %v3456_v39, %v3122_v36 }
 0x86b   : > { %v3133_v42 = vsub.f32 1.0, %v3131_v41 }
 0x86c   : > { %v3134_v45 = vsub.f32 1.0, %v3132_v51 }
 0x86d   : > { %v3137_v54 = vsub.f32 0.0, %v3133_v42 }
 0x86e   : > { %v3138_v10 = vsub.f32 0.0, %v3134_v45 }
 0x86f   : > { %v3139_v46 = vsel %vm3135_vm0, %v3137_v54, %v3133_v42 }
 0x870   : > { %v3141_v48 = vadd.f32 1.0, %v3139_v46  ;;  %v3140_v62 = vsel %vm3136_vm3, %v3138_v10, %v3134_v45 }
 0x871   : > { %v3142_v17 = vadd.f32 1.0, %v3140_v62 }
 0x872   : > { %v3143_v56 = vmul.f32 %v3141_v48, %v3091_v58 }
 0x873   : > { %v3144_v59 = vmul.f32 %v3142_v17, %v3092_v52 }
 0x874   : > { %v3145_v60 = vadd.f32 %v3143_v56, %v4172_v14 }
 0x875   : > { %v3146_v63 = vadd.f32 %v3144_v59, %v4175_v9 }
 0x876   : > { %3147 = vst [vmem:[%s255_s27] sm:$0xff] %v3145_v60 }
 0x877   : > { %3148 = vst [vmem:[%s255_s27 + $0x8] sm:$0xff] %v3146_v63 }
 0x878   : > { %3595 = shalt.err (!%p3592_p9)
}
 0x879   : > { %s3596_s25 = scalar_lea.hbm %s4267_s30, 256  ;;  %s3600_s8 = scalar_lea.hbm %s4316_s4, 512 }
 0x87a   : > { %p3597_p8 = scmp.ne.s32.totalorder %s4267_s30, %s3596_s25  ;;  %p3601_p6 = scmp.lt.u32.totalorder %s4267_s30, %s4316_s4 }
 0x87b   : > { %p3602_p10 = scmp.lt.u32.totalorder %s3600_s8, %s3596_s25  ;;  %p3604_p7 = scmp.lt.u32.totalorder %s3596_s25, %s4267_s30 }
 0x87c   : > { %p3598_p11 = pnand %p3597_p8, %p3847_p5 }
 0x87d   : > { %p3603_p3 = por %p3602_p10, %p3601_p6 }
 0x87e   : > { %p3599_p13 = pneg %p3598_p11 }
 0x87f   : > { %p3605_p12 = por %p3604_p7, %p3603_p3 }
 0x881   : > { %p3606_p2 = pnand %p3605_p12, %p3599_p13 }
 0x883   : > { %3609 = shalt.err (!%p3606_p2)
}
 0x884   : > { %3333 = dma.vmem_to_hbm [thread:$0]  (%p3847_p5), %s4269_s29, 256, %s4267_s30, %s3150_s19  }
 0x885 PF: > { %s3176_s24 = sand.u32 1, %s3648_s15   ;;  %p4336_p1 = scmp.ne.s32.totalorder %s4321_s22, 0 }
 0x886   : > { %p4337_p4 = scmp.ge.s32.totalorder %s3660_s18, 2  ;;  %s3177_s12 = scalar_lea.sflag [#allocation4], %s3176_s24 }
 0x888   : > { %p3350_p0 = pnand %p4337_p4, %p4336_p1 }
 0x88a   : > { %3643 = dma.done.wait (!%p3350_p0), %s3177_s12, 256  }
 0x88b   : > { %3645 = vsyncadd (!%p3350_p0), %s3177_s12, 4294967040  ;;  %p19_p9 = scmp.ge.s32.totalorder %s3815_s20, 4   ;;  %s4338_s15 = smov %s3652_s16 }
 0x88c   : > { %s4339_s16 = smov %s3656_s17  ;;  %s4340_s17 = smov %s3843_s26 }
 0x88d   : > { %s4341_s18 = smov %s3815_s20  ;;  %21 = sbr.rel (!%p19_p9) target bundleno = 7 (0x7), region = 94 }
 0x894   :  { %3182 = vsyncpa [#allocation3], 1 }
 0x895   :  { %3184 = vsyncpa [#allocation3 + $0x1], 1 }
 0x896   :  { %3185 = vsyncpa [#allocation6], 1 }
 0x897   :  { %3187 = vsyncpa [#allocation6 + $0x1], 1 }
 0x898   :  { %3188 = vsyncpa [#allocation9], 1 }
 0x899   :  { %3189 = vsyncpa [#allocation4], 1 }
 0x89a   :  { %3191 = vsyncpa [#allocation4 + $0x1], 1 }

</bundles_post_ra>
